<compile_context>
chip_gen: v6e
topology: v6e:2x2x1
jax: 0.10.0
libtpu: 0.0.40
codegen_flags: <defaults>
</compile_context>

<pallas_src>
import functools
import math

import jax
import jax.numpy as jnp
from jax.experimental import pallas as pl
from jax.experimental.pallas import tpu as pltpu

EPS = 1e-5                       # torch.nn.LayerNorm default eps
VMEM_LIMIT_BYTES = 48 * 1024 * 1024   # <= v7x 64 MiB physical; raise to ~96 MiB on v5e/v6e


def _cparams(num_axes=1):
    return pltpu.CompilerParams(
        dimension_semantics=("parallel",) * num_axes,
        vmem_limit_bytes=VMEM_LIMIT_BYTES)


def _pick_tile(n, target):
    """Largest block <= target that divides n and is a multiple of 8; else full n."""
    if n <= target:
        return n
    t = (target // 8) * 8
    while t >= 8:
        if n % t == 0:
            return t
        t -= 8
    return n


def _ln(x, g, b):
    mu = jnp.mean(x, axis=-1, keepdims=True)
    var = jnp.mean(jnp.square(x - mu), axis=-1, keepdims=True)
    return (x - mu) * jax.lax.rsqrt(var + EPS) * g + b


# ----------------------------- Pallas kernels ------------------------------ #

def _embed_pos_kernel(x_ref, pos_ref, o_ref, *, scale):
    # x_ref: (B, ts, E), pos_ref: (ts, E); o = embed_scale * x + pos (pos bcast over B)
    o_ref[...] = (x_ref[...] * scale + pos_ref[...][None, :, :]).astype(o_ref.dtype)


def _qkv_attn_kernel(x_ref, w_ref, b_ref, o_ref, k_buf, v_buf, *,
                     num_heads, head_dim, compute_dtype, exp_dtype):
    """Fused QKV projection + multi-head self-attention for one (batch, q-tile) cell.

    x_ref : (1, S, E) activation slab (resident along the q axis)
    w_ref : (E, 3E) in_proj weight (q columns pre-scaled by 1/sqrt(Dh))
    b_ref : (1, 3E) in_proj bias (q part pre-scaled)
    o_ref : (1, tq, E) attention output (compute_dtype)
    k_buf / v_buf : (S, E) VMEM scratch, recomputed at q-tile 0 of every batch.
    """
    e = num_heads * head_dim
    tq = o_ref.shape[1]
    b_all = b_ref[...]                                              # (1, 3E) f32

    @pl.when(pl.program_id(1) == 0)
    def _():
        xkv = x_ref[0].astype(w_ref.dtype)                          # (S, E)
        kv = jnp.dot(xkv, w_ref[:, e:], preferred_element_type=jnp.float32)
        kv = kv + b_all[0, e:]
        k_buf[...] = kv[:, :e].astype(compute_dtype)
        v_buf[...] = kv[:, e:].astype(compute_dtype)

    start = pl.multiple_of(pl.program_id(1) * tq, tq)
    xq = x_ref[0, pl.ds(start, tq), :].astype(w_ref.dtype)          # (tq, E)
    # 1/sqrt(Dh) already folded into the q columns of w/b.
    q = (jnp.dot(xq, w_ref[:, :e], preferred_element_type=jnp.float32)
         + b_all[0, :e]).astype(compute_dtype)                      # (tq, E)

    for h in range(num_heads):
        lo = h * head_dim
        # NT matmul: contract dim 1 of both operands (no explicit transpose).
        s = jax.lax.dot_general(
            q[:, lo:lo + head_dim], k_buf[:, lo:lo + head_dim],
            (((1,), (1,)), ((), ())), preferred_element_type=jnp.float32)   # (tq, S)
        s = s - jnp.max(s, axis=-1, keepdims=True)
        p = jnp.exp(s.astype(exp_dtype)).astype(jnp.float32)
        p = p * pl.reciprocal(jnp.sum(p, axis=-1, keepdims=True), approx=True)
        oh = jnp.dot(p.astype(compute_dtype), v_buf[:, lo:lo + head_dim],
                     preferred_element_type=jnp.float32)                    # (tq, Dh)
        o_ref[0, :, pl.ds(lo, head_dim)] = oh.astype(o_ref.dtype)


def _block_kernel(a_ref, r_ref, wo_ref, bo_ref, g0_ref, bt0_ref,
                  w1_ref, b1_ref, w2_ref, b2_ref, g1_ref, bt1_ref, o_ref):
    # fused: out_proj + residual + LN0 + fc1 + ReLU + fc2 + residual + LN1
    # (4E intermediate lives only in VMEM/vregs)
    a = a_ref[...].astype(wo_ref.dtype)
    y = jnp.dot(a, wo_ref[...], preferred_element_type=jnp.float32)
    y = y + bo_ref[...] + r_ref[...].astype(jnp.float32)
    x = _ln(y, g0_ref[...], bt0_ref[...])                                   # f32
    h = jnp.dot(x.astype(w1_ref.dtype), w1_ref[...], preferred_element_type=jnp.float32)
    h = jnp.maximum(h + b1_ref[...], 0.0)
    y2 = jnp.dot(h.astype(w2_ref.dtype), w2_ref[...], preferred_element_type=jnp.float32)
    y2 = y2 + b2_ref[...] + x
    o_ref[...] = _ln(y2, g1_ref[...], bt1_ref[...]).astype(o_ref.dtype)


def _final_ln_kernel(x_ref, g_ref, b_ref, o_ref):
    x = x_ref[...].astype(jnp.float32)                                      # (B, ts, E)
    o_ref[...] = _ln(x, g_ref[...], b_ref[...]).astype(o_ref.dtype)


# --------------------------- pallas_call wrappers --------------------------- #

def embed_pos(x_bse, pos, scale, ts):
    B, S, E = x_bse.shape
    return pl.pallas_call(
        functools.partial(_embed_pos_kernel, scale=scale),
        grid=(S // ts,),
        in_specs=[pl.BlockSpec((B, ts, E), lambda i: (0, i, 0)),
                  pl.BlockSpec((ts, E), lambda i: (i, 0))],
        out_specs=pl.BlockSpec((B, ts, E), lambda i: (0, i, 0)),
        out_shape=jax.ShapeDtypeStruct((B, S, E), jnp.float32),
        compiler_params=_cparams(1),
    )(x_bse, pos)


def fused_qkv_attention(x_bse, w, b, num_heads, compute_dtype, tq, exp_dtype):
    B, S, E = x_bse.shape
    E3 = w.shape[1]
    Dh = E // num_heads
    cbytes = jnp.dtype(compute_dtype).itemsize
    flops = int(B * (6 * S * E * E + 4 * S * S * E))
    trans = int(B * num_heads * S * S)
    bytes_acc = int(B * S * E * 4 + E * E3 * jnp.dtype(w.dtype).itemsize
                    + E3 * 4 + B * S * E * cbytes)
    kernel = functools.partial(_qkv_attn_kernel, num_heads=num_heads, head_dim=Dh,
                               compute_dtype=compute_dtype, exp_dtype=exp_dtype)
    return pl.pallas_call(
        kernel,
        grid=(B, S // tq),
        in_specs=[pl.BlockSpec((1, S, E), lambda bi, qi: (bi, 0, 0)),   # resident slab
                  pl.BlockSpec((E, E3), lambda bi, qi: (0, 0)),
                  pl.BlockSpec((1, E3), lambda bi, qi: (0, 0))],
        out_specs=pl.BlockSpec((1, tq, E), lambda bi, qi: (bi, qi, 0)),
        out_shape=jax.ShapeDtypeStruct((B, S, E), compute_dtype),
        scratch_shapes=[pltpu.VMEM((S, E), compute_dtype),
                        pltpu.VMEM((S, E), compute_dtype)],
        compiler_params=pltpu.CompilerParams(
            dimension_semantics=("parallel", "arbitrary"),
            vmem_limit_bytes=VMEM_LIMIT_BYTES),
        cost_estimate=pl.CostEstimate(flops=flops, transcendentals=trans,
                                      bytes_accessed=bytes_acc),
    )(x_bse, w, b.reshape(1, E3))


def attn_mlp_block(attn2d, x2d, p, tm):
    R, E = x2d.shape
    F = p["fc1_w"].shape[1]
    const = lambda i: (0, 0)
    wbytes = jnp.dtype(p["out_proj_w"].dtype).itemsize
    flops = int(R * (2 * E * E + 4 * E * F))
    bytes_acc = int(R * E * (jnp.dtype(attn2d.dtype).itemsize + 4 + 4)
                    + (E * E + 2 * E * F) * wbytes)
    return pl.pallas_call(
        _block_kernel,
        grid=(R // tm,),
        in_specs=[pl.BlockSpec((tm, E), lambda i: (i, 0)),    # attention output
                  pl.BlockSpec((tm, E), lambda i: (i, 0)),    # residual
                  pl.BlockSpec((E, E), const),                # out_proj_w
                  pl.BlockSpec((1, E), const),                # out_proj_b
                  pl.BlockSpec((1, E), const),                # ln0_g
                  pl.BlockSpec((1, E), const),                # ln0_b
                  pl.BlockSpec((E, F), const),                # fc1_w
                  pl.BlockSpec((1, F), const),                # fc1_b
                  pl.BlockSpec((F, E), const),                # fc2_w
                  pl.BlockSpec((1, E), const),                # fc2_b
                  pl.BlockSpec((1, E), const),                # ln1_g
                  pl.BlockSpec((1, E), const)],               # ln1_b
        out_specs=pl.BlockSpec((tm, E), lambda i: (i, 0)),
        out_shape=jax.ShapeDtypeStruct((R, E), jnp.float32),
        compiler_params=_cparams(1),
        cost_estimate=pl.CostEstimate(flops=flops, transcendentals=0,
                                      bytes_accessed=bytes_acc),
    )(attn2d, x2d, p["out_proj_w"], p["out_proj_b"].reshape(1, E),
      p["ln0_g"].reshape(1, E), p["ln0_b"].reshape(1, E),
      p["fc1_w"], p["fc1_b"].reshape(1, F), p["fc2_w"],
      p["fc2_b"].reshape(1, E), p["ln1_g"].reshape(1, E), p["ln1_b"].reshape(1, E))


def final_ln(x_bse, g, b, ts):
    B, S, E = x_bse.shape
    const = lambda i: (0, 0)
    return pl.pallas_call(
        _final_ln_kernel,
        grid=(S // ts,),
        in_specs=[pl.BlockSpec((B, ts, E), lambda i: (0, i, 0)),
                  pl.BlockSpec((1, E), const),
                  pl.BlockSpec((1, E), const)],
        out_specs=pl.BlockSpec((B, ts, E), lambda i: (0, i, 0)),
        out_shape=jax.ShapeDtypeStruct((B, S, E), jnp.float32),
        compiler_params=_cparams(1),
    )(x_bse, g.reshape(1, E), b.reshape(1, E))


# ------------------------------- parameters -------------------------------- #

def _xavier_uniform_T(key, out_f, in_f):
    # torch.nn.init.xavier_uniform_ on a (out, in) weight; stored transposed (in, out)
    bound = math.sqrt(6.0 / (in_f + out_f))
    w = jax.random.uniform(key, (out_f, in_f), jnp.float32, -bound, bound)
    return w.T


def init_layer_params(key, embed_dim):
    e = embed_dim
    ks = jax.random.split(key, 4)
    return dict(
        in_proj_w=_xavier_uniform_T(ks[0], 3 * e, e),
        in_proj_b=jnp.zeros((3 * e,), jnp.float32),
        out_proj_w=_xavier_uniform_T(ks[1], e, e),
        out_proj_b=jnp.zeros((e,), jnp.float32),
        fc1_w=_xavier_uniform_T(ks[2], 4 * e, e),
        fc1_b=jnp.zeros((4 * e,), jnp.float32),
        fc2_w=_xavier_uniform_T(ks[3], e, 4 * e),
        fc2_b=jnp.zeros((e,), jnp.float32),
        ln0_g=jnp.ones((e,), jnp.float32), ln0_b=jnp.zeros((e,), jnp.float32),
        ln1_g=jnp.ones((e,), jnp.float32), ln1_b=jnp.zeros((e,), jnp.float32),
    )


def init_params(key, embed_dim, num_layers):
    keys = jax.random.split(key, num_layers)
    return dict(
        layers=[init_layer_params(k, embed_dim) for k in keys],
        ln_g=jnp.ones((embed_dim,), jnp.float32),
        ln_b=jnp.zeros((embed_dim,), jnp.float32),
    )


def prepare_params(params, num_heads, matmul_dtype):
    """Fold 1/sqrt(Dh) into the Q columns of in_proj and cast matmul weights."""
    def conv(p):
        q = dict(p)
        e = p["out_proj_w"].shape[0]
        scale = (e // num_heads) ** -0.5
        col_scale = jnp.concatenate([jnp.full((e,), scale, jnp.float32),
                                     jnp.ones((2 * e,), jnp.float32)])
        q["in_proj_w"] = (p["in_proj_w"] * col_scale[None, :]).astype(matmul_dtype)
        q["in_proj_b"] = p["in_proj_b"] * col_scale          # bias stays f32
        for name in ("out_proj_w", "fc1_w", "fc2_w"):
            q[name] = p[name].astype(matmul_dtype)
        return q
    return dict(layers=[conv(p) for p in params["layers"]],
                ln_g=params["ln_g"], ln_b=params["ln_b"])


def sinusoidal_positional_embedding(num_positions, dim):
    # fairseq SinusoidalPositionalEmbedding table (padding_idx = 0)
    half = dim // 2
    emb = math.log(10000.0) / (half - 1)
    freqs = jnp.exp(jnp.arange(half, dtype=jnp.float32) * -emb)
    args = jnp.arange(num_positions, dtype=jnp.float32)[:, None] * freqs[None, :]
    pe = jnp.concatenate([jnp.sin(args), jnp.cos(args)], axis=1)
    if dim % 2 == 1:
        pe = jnp.concatenate([pe, jnp.zeros((num_positions, 1), jnp.float32)], axis=1)
    pe = pe.at[0].set(0.0)
    return pe


# -------------------------------- forward ---------------------------------- #

def transformer_encoder_forward(prep, x_in, *, num_heads,
                                compute_dtype=jnp.bfloat16, row_tile=512,
                                q_tile=256, exp_dtype=jnp.float32):
    S, B, E = x_in.shape
    embed_scale = math.sqrt(E)
    pos = sinusoidal_positional_embedding(S + 1, E)[1:S + 1]          # (S, E)

    ts = _pick_tile(S, max(8, row_tile // max(B, 1)))
    tm = _pick_tile(B * S, row_tile)
    tq = _pick_tile(S, q_tile)

    # Single layout flip to batch-major for the whole stack (not per layer).
    x_bse = jnp.transpose(x_in, (1, 0, 2))                            # (B, S, E)
    x_bse = embed_pos(x_bse, pos, embed_scale, ts)                    # scale + pos
    x2d = x_bse.reshape(B * S, E)                                     # batch-major rows

    for p in prep["layers"]:
        # fused qkv-projection + attention (qkv never hits HBM); output in bf16
        attn = fused_qkv_attention(x2d.reshape(B, S, E), p["in_proj_w"],
                                   p["in_proj_b"], num_heads, compute_dtype,
                                   tq, exp_dtype)
        # fused out_proj + residual + LN0 + fc1 + ReLU + fc2 + residual + LN1
        x2d = attn_mlp_block(attn.reshape(B * S, E), x2d, p, tm)

    out = final_ln(x2d.reshape(B, S, E), prep["ln_g"], prep["ln_b"], ts)
    return jnp.transpose(out, (1, 0, 2))                              # back to (S, B, E)


# ------------------------------ pure-JAX ref -------------------------------- #

def _ref_ln(x, g, b):
    mu = jnp.mean(x, axis=-1, keepdims=True)
    var = jnp.mean(jnp.square(x - mu), axis=-1, keepdims=True)
    return (x - mu) * jax.lax.rsqrt(var + EPS) * g + b


def reference_forward(prep, x_in, num_heads, compute_dtype):
    """Mirrors the kernel's mixed precision (operand casts, f32 accumulation).
    Uses the prepared params (q-scale already folded into in_proj)."""
    S, B, E = x_in.shape
    H = num_heads
    Dh = E // H
    pos = sinusoidal_positional_embedding(S + 1, E)[1:S + 1]

    def mm(a, w):
        return jnp.dot(a.astype(w.dtype), w, preferred_element_type=jnp.float32)

    x = jnp.transpose(x_in, (1, 0, 2)) * math.sqrt(E) + pos[None, :, :]   # (B,S,E)
    x = x.reshape(B * S, E)
    for p in prep["layers"]:
        residual = x
        qkv = (mm(x, p["in_proj_w"]) + p["in_proj_b"]).reshape(B, S, 3 * E)
        q = qkv[..., :E].reshape(B, S, H, Dh).astype(compute_dtype)   # scale folded in
        k = qkv[..., E:2 * E].reshape(B, S, H, Dh).astype(compute_dtype)
        v = qkv[..., 2 * E:].reshape(B, S, H, Dh).astype(compute_dtype)
        s = jnp.einsum("bqhd,bkhd->bhqk", q, k, preferred_element_type=jnp.float32)
        s = s - jnp.max(s, axis=-1, keepdims=True)
        pm = jnp.exp(s)
        pm = pm / jnp.sum(pm, axis=-1, keepdims=True)
        o = jnp.einsum("bhqk,bkhd->bqhd", pm.astype(compute_dtype), v,
                       preferred_element_type=jnp.float32).reshape(B * S, E)
        o = mm(o.astype(compute_dtype), p["out_proj_w"]) + p["out_proj_b"]
        x = _ref_ln(residual + o, p["ln0_g"], p["ln0_b"])
        residual = x
        h = jnp.maximum(mm(x, p["fc1_w"]) + p["fc1_b"], 0.0)
        h = mm(h, p["fc2_w"]) + p["fc2_b"]
        x = _ref_ln(residual + h, p["ln1_g"], p["ln1_b"])
    x = _ref_ln(x, prep["ln_g"], prep["ln_b"])
    return jnp.transpose(x.reshape(B, S, E), (1, 0, 2))


# ---------------------------------- main ------------------------------------ #

if __name__ == "__main__":
    S, B, E, H, L = 8, 2, 32, 4, 2   # seq_len, batch, embed_dim, heads, layers

    key = jax.random.PRNGKey(0)
    k_x, k_p = jax.random.split(key)
    x_in = jax.random.normal(k_x, (S, B, E), jnp.float32)
    params = init_params(k_p, E, L)

    # Validate both the exact-f32 semantics and the bf16-operand fast path.
    for cdtype, tol in ((jnp.float32, 2e-2), (jnp.bfloat16, 2e-2)):
        prep = prepare_params(params, H, cdtype)
        fwd = jax.jit(functools.partial(transformer_encoder_forward,
                                        num_heads=H, compute_dtype=cdtype))
        out = jax.block_until_ready(fwd(prep, x_in))
        ref = reference_forward(prep, x_in, H, cdtype)
        assert out.shape == (S, B, E)
        assert jnp.allclose(out, ref, atol=tol, rtol=tol), \
            f"mismatch vs reference ({jnp.dtype(cdtype).name})"

    print("KERNEL_OK")
</pallas_src>

<mosaic_0001>
module attributes {stable_mosaic.version = 11 : i64} {
  func.func @_embed_pos_kernel(%arg0: i32, %arg1: memref<2x8x32xf32, #tpu.memory_space<vmem>>, %arg2: memref<8x32xf32, #tpu.memory_space<vmem>>, %arg3: memref<2x8x32xf32, #tpu.memory_space<vmem>>) attributes {dimension_semantics = [#tpu.dimension_semantics<parallel>], iteration_bounds = array<i64: 1>, scalar_prefetch = 0 : i64, scratch_operands = 0 : i64, tpu.core_type = #tpu.core_type<tc>, window_params = [{transform_indices = @transform_0, window_bounds = array<i64: 2, 8, 32>}, {transform_indices = @transform_1, window_bounds = array<i64: 8, 32>}, {transform_indices = @transform_2, window_bounds = array<i64: 2, 8, 32>}]} {
    %c0 = arith.constant 0 : index
    %c0_0 = arith.constant 0 : index
    %c0_1 = arith.constant 0 : index
    %0 = vector.load %arg1[%c0, %c0_0, %c0_1] : memref<2x8x32xf32, #tpu.memory_space<vmem>>, vector<2x8x32xf32>
    %cst = arith.constant 5.65685415 : f32
    %1 = vector.broadcast %cst : f32 to vector<2x8x32xf32>
    %2 = arith.mulf %0, %1 : vector<2x8x32xf32>
    %c0_2 = arith.constant 0 : index
    %c0_3 = arith.constant 0 : index
    %3 = vector.load %arg2[%c0_2, %c0_3] : memref<8x32xf32, #tpu.memory_space<vmem>>, vector<8x32xf32>
    %4 = vector.shape_cast %3 : vector<8x32xf32> to vector<1x8x32xf32>
    %5 = vector.broadcast %4 : vector<1x8x32xf32> to vector<2x8x32xf32>
    %6 = arith.addf %2, %5 : vector<2x8x32xf32>
    %c0_4 = arith.constant 0 : index
    %c0_5 = arith.constant 0 : index
    %c0_6 = arith.constant 0 : index
    %7 = vector.load %arg3[%c0_4, %c0_5, %c0_6] : memref<2x8x32xf32, #tpu.memory_space<vmem>>, vector<2x8x32xf32>
    tpu.vector_store %arg3[%c0_4, %c0_5, %c0_6], %6 {strides = array<i32>} : memref<2x8x32xf32, #tpu.memory_space<vmem>>, vector<2x8x32xf32>,
    return
  }
  func.func @transform_0(%arg0: i32) -> (i32, i32, i32) {
    %c0_i32 = arith.constant 0 : i32
    %c0_i32_0 = arith.constant 0 : i32
    %c0_i32_1 = arith.constant 0 : i32
    return %c0_i32, %arg0, %c0_i32_0 : i32, i32, i32
  }
  func.func @transform_1(%arg0: i32) -> (i32, i32) {
    %c0_i32 = arith.constant 0 : i32
    %c0_i32_0 = arith.constant 0 : i32
    return %arg0, %c0_i32 : i32, i32
  }
  func.func @transform_2(%arg0: i32) -> (i32, i32, i32) {
    %c0_i32 = arith.constant 0 : i32
    %c0_i32_0 = arith.constant 0 : i32
    %c0_i32_1 = arith.constant 0 : i32
    return %c0_i32, %arg0, %c0_i32_0 : i32, i32, i32
  }
}

module attributes {stable_mosaic.version = 11 : i64} {
  func.func @_qkv_attn_kernel(%arg0: i32, %arg1: i32, %arg2: memref<1x8x32xf32, #tpu.memory_space<vmem>>, %arg3: memref<32x96xf32, #tpu.memory_space<vmem>>, %arg4: memref<1x96xf32, #tpu.memory_space<vmem>>, %arg5: memref<1x8x32xf32, #tpu.memory_space<vmem>>, %arg6: memref<8x32xf32, #tpu.memory_space<vmem>>, %arg7: memref<8x32xf32, #tpu.memory_space<vmem>>) attributes {dimension_semantics = [#tpu.dimension_semantics<parallel>, #tpu.dimension_semantics<arbitrary>], iteration_bounds = array<i64: 2, 1>, scalar_prefetch = 0 : i64, scratch_operands = 2 : i64, tpu.core_type = #tpu.core_type<tc>, window_params = [{transform_indices = @transform_0, window_bounds = array<i64: 1, 8, 32>}, {pipeline_mode = #tpu.pipeline_mode<synchronous>, transform_indices = @transform_1, window_bounds = array<i64: 32, 96>}, {pipeline_mode = #tpu.pipeline_mode<synchronous>, transform_indices = @transform_2, window_bounds = array<i64: 1, 96>}, {transform_indices = @transform_3, window_bounds = array<i64: 1, 8, 32>}]} {
    %c0 = arith.constant 0 : index
    %c0_0 = arith.constant 0 : index
    %0 = vector.load %arg4[%c0, %c0_0] : memref<1x96xf32, #tpu.memory_space<vmem>>, vector<1x96xf32>
    %c0_i32 = arith.constant 0 : i32
    %1 = arith.cmpi eq, %arg1, %c0_i32 : i32
    %2 = arith.extui %1 : i1 to i32
    %c0_i32_1 = arith.constant 0 : i32
    %3 = arith.cmpi ne, %2, %c0_i32_1 : i32
    scf.if %3 {
      %c0_47 = arith.constant 0 : index
      %c0_48 = arith.constant 0 : index
      %c0_49 = arith.constant 0 : index
      %88 = vector.load %arg2[%c0_47, %c0_48, %c0_49] : memref<1x8x32xf32, #tpu.memory_space<vmem>>, vector<1x8x32xf32>
      %89 = vector.shape_cast %88 : vector<1x8x32xf32> to vector<8x32xf32>
      %c0_50 = arith.constant 0 : index
      %c32 = arith.constant 32 : index
      %90 = vector.load %arg3[%c0_50, %c32] : memref<32x96xf32, #tpu.memory_space<vmem>>, vector<32x64xf32>
      %cst_51 = arith.constant dense<0.000000e+00> : vector<8x64xf32>
      %91 = tpu.matmul %89, %90, %cst_51 {dimension_numbers = #tpu.dot_dimension_numbers<[1], [0], [0], [1], [0, 0, 1, 1], [], []>} : vector<8x32xf32>, vector<32x64xf32>, vector<8x64xf32> -> vector<8x64xf32>
      %92 = vector.extract_strided_slice %0 {offsets = [0, 32], sizes = [1, 64], strides = [1, 1]} : vector<1x96xf32> to vector<1x64xf32>
      %93 = vector.shape_cast %92 : vector<1x64xf32> to vector<64xf32>
      %94 = vector.shape_cast %93 : vector<64xf32> to vector<1x64xf32>
      %95 = vector.broadcast %94 : vector<1x64xf32> to vector<8x64xf32>
      %96 = arith.addf %91, %95 : vector<8x64xf32>
      %97 = vector.extract_strided_slice %96 {offsets = [0, 0], sizes = [8, 32], strides = [1, 1]} : vector<8x64xf32> to vector<8x32xf32>
      %c0_52 = arith.constant 0 : index
      %c0_53 = arith.constant 0 : index
      %98 = vector.load %arg6[%c0_52, %c0_53] : memref<8x32xf32, #tpu.memory_space<vmem>>, vector<8x32xf32>
      tpu.vector_store %arg6[%c0_52, %c0_53], %97 {strides = array<i32>} : memref<8x32xf32, #tpu.memory_space<vmem>>, vector<8x32xf32>,
      %99 = vector.extract_strided_slice %96 {offsets = [0, 32], sizes = [8, 32], strides = [1, 1]} : vector<8x64xf32> to vector<8x32xf32>
      %c0_54 = arith.constant 0 : index
      %c0_55 = arith.constant 0 : index
      %100 = vector.load %arg7[%c0_54, %c0_55] : memref<8x32xf32, #tpu.memory_space<vmem>>, vector<8x32xf32>
      tpu.vector_store %arg7[%c0_54, %c0_55], %99 {strides = array<i32>} : memref<8x32xf32, #tpu.memory_space<vmem>>, vector<8x32xf32>,
    } else {
    }
    %c8_i32 = arith.constant 8 : i32
    %4 = arith.muli %arg1, %c8_i32 : i32
    %5 = tpu.assume_multiple %4, 8 : i32
    %c0_2 = arith.constant 0 : index
    %6 = arith.index_cast %5 : i32 to index
    %c0_3 = arith.constant 0 : index
    %7 = vector.load %arg2[%c0_2, %6, %c0_3] : memref<1x8x32xf32, #tpu.memory_space<vmem>>, vector<1x8x32xf32>
    %8 = vector.shape_cast %7 : vector<1x8x32xf32> to vector<8x32xf32>
    %c0_4 = arith.constant 0 : index
    %c0_5 = arith.constant 0 : index
    %9 = vector.load %arg3[%c0_4, %c0_5] : memref<32x96xf32, #tpu.memory_space<vmem>>, vector<32x32xf32>
    %cst = arith.constant dense<0.000000e+00> : vector<8x32xf32>
    %10 = tpu.matmul %8, %9, %cst {dimension_numbers = #tpu.dot_dimension_numbers<[1], [0], [0], [1], [0, 0, 1, 1], [], []>} : vector<8x32xf32>, vector<32x32xf32>, vector<8x32xf32> -> vector<8x32xf32>
    %11 = vector.extract_strided_slice %0 {offsets = [0, 0], sizes = [1, 32], strides = [1, 1]} : vector<1x96xf32> to vector<1x32xf32>
    %12 = vector.shape_cast %11 : vector<1x32xf32> to vector<32xf32>
    %13 = vector.shape_cast %12 : vector<32xf32> to vector<1x32xf32>
    %14 = vector.broadcast %13 : vector<1x32xf32> to vector<8x32xf32>
    %15 = arith.addf %10, %14 : vector<8x32xf32>
    %16 = vector.extract_strided_slice %15 {offsets = [0, 0], sizes = [8, 8], strides = [1, 1]} : vector<8x32xf32> to vector<8x8xf32>
    %c0_6 = arith.constant 0 : index
    %c0_7 = arith.constant 0 : index
    %17 = vector.load %arg6[%c0_6, %c0_7] : memref<8x32xf32, #tpu.memory_space<vmem>>, vector<8x8xf32>
    %cst_8 = arith.constant dense<0.000000e+00> : vector<8x8xf32>
    %18 = tpu.matmul %16, %17, %cst_8 {dimension_numbers = #tpu.dot_dimension_numbers<[1], [1], [0], [0], [0, 0, 1, 0], [], []>} : vector<8x8xf32>, vector<8x8xf32>, vector<8x8xf32> -> vector<8x8xf32>
    %cst_9 = arith.constant dense<0xFF800000> : vector<8xf32>
    %19 = vector.multi_reduction <maximumf>, %18, %cst_9 [1] : vector<8x8xf32> to vector<8xf32>
    %20 = vector.shape_cast %19 : vector<8xf32> to vector<8x1xf32>
    %21 = vector.broadcast %20 : vector<8x1xf32> to vector<8x8xf32>
    %22 = arith.subf %18, %21 : vector<8x8xf32>
    %23 = math.exp %22 : vector<8x8xf32>
    %cst_10 = arith.constant dense<0.000000e+00> : vector<8xf32>
    %24 = vector.multi_reduction <add>, %23, %cst_10 [1] : vector<8x8xf32> to vector<8xf32>
    %25 = vector.shape_cast %24 : vector<8xf32> to vector<8x1xf32>
    %26 = tpu.reciprocal %25 {approx = true} : vector<8x1xf32> -> vector<8x1xf32>
    %27 = vector.broadcast %26 : vector<8x1xf32> to vector<8x8xf32>
    %28 = arith.mulf %23, %27 : vector<8x8xf32>
    %c0_11 = arith.constant 0 : index
    %c0_12 = arith.constant 0 : index
    %29 = vector.load %arg7[%c0_11, %c0_12] : memref<8x32xf32, #tpu.memory_space<vmem>>, vector<8x8xf32>
    %cst_13 = arith.constant dense<0.000000e+00> : vector<8x8xf32>
    %30 = tpu.matmul %28, %29, %cst_13 {dimension_numbers = #tpu.dot_dimension_numbers<[1], [0], [0], [1], [0, 0, 1, 1], [], []>} : vector<8x8xf32>, vector<8x8xf32>, vector<8x8xf32> -> vector<8x8xf32>
    %c0_14 = arith.constant 0 : index
    %c0_15 = arith.constant 0 : index
    %c0_16 = arith.constant 0 : index
    %31 = vector.load %arg5[%c0_14, %c0_15, %c0_16] : memref<1x8x32xf32, #tpu.memory_space<vmem>>, vector<1x8x8xf32>
    %32 = vector.shape_cast %31 : vector<1x8x8xf32> to vector<8x8xf32>
    %33 = vector.shape_cast %30 : vector<8x8xf32> to vector<1x8x8xf32>
    tpu.vector_store %arg5[%c0_14, %c0_15, %c0_16], %33 {strides = array<i32>} : memref<1x8x32xf32, #tpu.memory_space<vmem>>, vector<1x8x8xf32>,
    %34 = vector.extract_strided_slice %15 {offsets = [0, 8], sizes = [8, 8], strides = [1, 1]} : vector<8x32xf32> to vector<8x8xf32>
    %c0_17 = arith.constant 0 : index
    %c8 = arith.constant 8 : index
    %35 = vector.load %arg6[%c0_17, %c8] : memref<8x32xf32, #tpu.memory_space<vmem>>, vector<8x8xf32>
    %cst_18 = arith.constant dense<0.000000e+00> : vector<8x8xf32>
    %36 = tpu.matmul %34, %35, %cst_18 {dimension_numbers = #tpu.dot_dimension_numbers<[1], [1], [0], [0], [0, 0, 1, 0], [], []>} : vector<8x8xf32>, vector<8x8xf32>, vector<8x8xf32> -> vector<8x8xf32>
    %cst_19 = arith.constant dense<0xFF800000> : vector<8xf32>
    %37 = vector.multi_reduction <maximumf>, %36, %cst_19 [1] : vector<8x8xf32> to vector<8xf32>
    %38 = vector.shape_cast %37 : vector<8xf32> to vector<8x1xf32>
    %39 = vector.broadcast %38 : vector<8x1xf32> to vector<8x8xf32>
    %40 = arith.subf %36, %39 : vector<8x8xf32>
    %41 = math.exp %40 : vector<8x8xf32>
    %cst_20 = arith.constant dense<0.000000e+00> : vector<8xf32>
    %42 = vector.multi_reduction <add>, %41, %cst_20 [1] : vector<8x8xf32> to vector<8xf32>
    %43 = vector.shape_cast %42 : vector<8xf32> to vector<8x1xf32>
    %44 = tpu.reciprocal %43 {approx = true} : vector<8x1xf32> -> vector<8x1xf32>
    %45 = vector.broadcast %44 : vector<8x1xf32> to vector<8x8xf32>
    %46 = arith.mulf %41, %45 : vector<8x8xf32>
    %c0_21 = arith.constant 0 : index
    %c8_22 = arith.constant 8 : index
    %47 = vector.load %arg7[%c0_21, %c8_22] : memref<8x32xf32, #tpu.memory_space<vmem>>, vector<8x8xf32>
    %cst_23 = arith.constant dense<0.000000e+00> : vector<8x8xf32>
    %48 = tpu.matmul %46, %47, %cst_23 {dimension_numbers = #tpu.dot_dimension_numbers<[1], [0], [0], [1], [0, 0, 1, 1], [], []>} : vector<8x8xf32>, vector<8x8xf32>, vector<8x8xf32> -> vector<8x8xf32>
    %c0_24 = arith.constant 0 : index
    %c0_25 = arith.constant 0 : index
    %c8_26 = arith.constant 8 : index
    %49 = vector.load %arg5[%c0_24, %c0_25, %c8_26] : memref<1x8x32xf32, #tpu.memory_space<vmem>>, vector<1x8x8xf32>
    %50 = vector.shape_cast %49 : vector<1x8x8xf32> to vector<8x8xf32>
    %51 = vector.shape_cast %48 : vector<8x8xf32> to vector<1x8x8xf32>
    tpu.vector_store %arg5[%c0_24, %c0_25, %c8_26], %51 {strides = array<i32>} : memref<1x8x32xf32, #tpu.memory_space<vmem>>, vector<1x8x8xf32>,
    %52 = vector.extract_strided_slice %15 {offsets = [0, 16], sizes = [8, 8], strides = [1, 1]} : vector<8x32xf32> to vector<8x8xf32>
    %c0_27 = arith.constant 0 : index
    %c16 = arith.constant 16 : index
    %53 = vector.load %arg6[%c0_27, %c16] : memref<8x32xf32, #tpu.memory_space<vmem>>, vector<8x8xf32>
    %cst_28 = arith.constant dense<0.000000e+00> : vector<8x8xf32>
    %54 = tpu.matmul %52, %53, %cst_28 {dimension_numbers = #tpu.dot_dimension_numbers<[1], [1], [0], [0], [0, 0, 1, 0], [], []>} : vector<8x8xf32>, vector<8x8xf32>, vector<8x8xf32> -> vector<8x8xf32>
    %cst_29 = arith.constant dense<0xFF800000> : vector<8xf32>
    %55 = vector.multi_reduction <maximumf>, %54, %cst_29 [1] : vector<8x8xf32> to vector<8xf32>
    %56 = vector.shape_cast %55 : vector<8xf32> to vector<8x1xf32>
    %57 = vector.broadcast %56 : vector<8x1xf32> to vector<8x8xf32>
    %58 = arith.subf %54, %57 : vector<8x8xf32>
    %59 = math.exp %58 : vector<8x8xf32>
    %cst_30 = arith.constant dense<0.000000e+00> : vector<8xf32>
    %60 = vector.multi_reduction <add>, %59, %cst_30 [1] : vector<8x8xf32> to vector<8xf32>
    %61 = vector.shape_cast %60 : vector<8xf32> to vector<8x1xf32>
    %62 = tpu.reciprocal %61 {approx = true} : vector<8x1xf32> -> vector<8x1xf32>
    %63 = vector.broadcast %62 : vector<8x1xf32> to vector<8x8xf32>
    %64 = arith.mulf %59, %63 : vector<8x8xf32>
    %c0_31 = arith.constant 0 : index
    %c16_32 = arith.constant 16 : index
    %65 = vector.load %arg7[%c0_31, %c16_32] : memref<8x32xf32, #tpu.memory_space<vmem>>, vector<8x8xf32>
    %cst_33 = arith.constant dense<0.000000e+00> : vector<8x8xf32>
    %66 = tpu.matmul %64, %65, %cst_33 {dimension_numbers = #tpu.dot_dimension_numbers<[1], [0], [0], [1], [0, 0, 1, 1], [], []>} : vector<8x8xf32>, vector<8x8xf32>, vector<8x8xf32> -> vector<8x8xf32>
    %c0_34 = arith.constant 0 : index
    %c0_35 = arith.constant 0 : index
    %c16_36 = arith.constant 16 : index
    %67 = vector.load %arg5[%c0_34, %c0_35, %c16_36] : memref<1x8x32xf32, #tpu.memory_space<vmem>>, vector<1x8x8xf32>
    %68 = vector.shape_cast %67 : vector<1x8x8xf32> to vector<8x8xf32>
    %69 = vector.shape_cast %66 : vector<8x8xf32> to vector<1x8x8xf32>
    tpu.vector_store %arg5[%c0_34, %c0_35, %c16_36], %69 {strides = array<i32>} : memref<1x8x32xf32, #tpu.memory_space<vmem>>, vector<1x8x8xf32>,
    %70 = vector.extract_strided_slice %15 {offsets = [0, 24], sizes = [8, 8], strides = [1, 1]} : vector<8x32xf32> to vector<8x8xf32>
    %c0_37 = arith.constant 0 : index
    %c24 = arith.constant 24 : index
    %71 = vector.load %arg6[%c0_37, %c24] : memref<8x32xf32, #tpu.memory_space<vmem>>, vector<8x8xf32>
    %cst_38 = arith.constant dense<0.000000e+00> : vector<8x8xf32>
    %72 = tpu.matmul %70, %71, %cst_38 {dimension_numbers = #tpu.dot_dimension_numbers<[1], [1], [0], [0], [0, 0, 1, 0], [], []>} : vector<8x8xf32>, vector<8x8xf32>, vector<8x8xf32> -> vector<8x8xf32>
    %cst_39 = arith.constant dense<0xFF800000> : vector<8xf32>
    %73 = vector.multi_reduction <maximumf>, %72, %cst_39 [1] : vector<8x8xf32> to vector<8xf32>
    %74 = vector.shape_cast %73 : vector<8xf32> to vector<8x1xf32>
    %75 = vector.broadcast %74 : vector<8x1xf32> to vector<8x8xf32>
    %76 = arith.subf %72, %75 : vector<8x8xf32>
    %77 = math.exp %76 : vector<8x8xf32>
    %cst_40 = arith.constant dense<0.000000e+00> : vector<8xf32>
    %78 = vector.multi_reduction <add>, %77, %cst_40 [1] : vector<8x8xf32> to vector<8xf32>
    %79 = vector.shape_cast %78 : vector<8xf32> to vector<8x1xf32>
    %80 = tpu.reciprocal %79 {approx = true} : vector<8x1xf32> -> vector<8x1xf32>
    %81 = vector.broadcast %80 : vector<8x1xf32> to vector<8x8xf32>
    %82 = arith.mulf %77, %81 : vector<8x8xf32>
    %c0_41 = arith.constant 0 : index
    %c24_42 = arith.constant 24 : index
    %83 = vector.load %arg7[%c0_41, %c24_42] : memref<8x32xf32, #tpu.memory_space<vmem>>, vector<8x8xf32>
    %cst_43 = arith.constant dense<0.000000e+00> : vector<8x8xf32>
    %84 = tpu.matmul %82, %83, %cst_43 {dimension_numbers = #tpu.dot_dimension_numbers<[1], [0], [0], [1], [0, 0, 1, 1], [], []>} : vector<8x8xf32>, vector<8x8xf32>, vector<8x8xf32> -> vector<8x8xf32>
    %c0_44 = arith.constant 0 : index
    %c0_45 = arith.constant 0 : index
    %c24_46 = arith.constant 24 : index
    %85 = vector.load %arg5[%c0_44, %c0_45, %c24_46] : memref<1x8x32xf32, #tpu.memory_space<vmem>>, vector<1x8x8xf32>
    %86 = vector.shape_cast %85 : vector<1x8x8xf32> to vector<8x8xf32>
    %87 = vector.shape_cast %84 : vector<8x8xf32> to vector<1x8x8xf32>
    tpu.vector_store %arg5[%c0_44, %c0_45, %c24_46], %87 {strides = array<i32>} : memref<1x8x32xf32, #tpu.memory_space<vmem>>, vector<1x8x8xf32>,
    return
  }
  func.func @transform_0(%arg0: i32, %arg1: i32) -> (i32, i32, i32) {
    %c0_i32 = arith.constant 0 : i32
    %c0_i32_0 = arith.constant 0 : i32
    %c0_i32_1 = arith.constant 0 : i32
    return %arg0, %c0_i32, %c0_i32_0 : i32, i32, i32
  }
  func.func @transform_1(%arg0: i32, %arg1: i32) -> (i32, i32) {
    %c0_i32 = arith.constant 0 : i32
    %c0_i32_0 = arith.constant 0 : i32
    %c0_i32_1 = arith.constant 0 : i32
    return %c0_i32, %c0_i32_0 : i32, i32
  }
  func.func @transform_2(%arg0: i32, %arg1: i32) -> (i32, i32) {
    %c0_i32 = arith.constant 0 : i32
    %c0_i32_0 = arith.constant 0 : i32
    %c0_i32_1 = arith.constant 0 : i32
    return %c0_i32, %c0_i32_0 : i32, i32
  }
  func.func @transform_3(%arg0: i32, %arg1: i32) -> (i32, i32, i32) {
    %c0_i32 = arith.constant 0 : i32
    %c0_i32_0 = arith.constant 0 : i32
    return %arg0, %arg1, %c0_i32 : i32, i32, i32
  }
}

module attributes {stable_mosaic.version = 11 : i64} {
  func.func @_final_ln_kernel(%arg0: i32, %arg1: memref<2x8x32xf32, #tpu.memory_space<vmem>>, %arg2: memref<1x32xf32, #tpu.memory_space<vmem>>, %arg3: memref<1x32xf32, #tpu.memory_space<vmem>>, %arg4: memref<2x8x32xf32, #tpu.memory_space<vmem>>) attributes {dimension_semantics = [#tpu.dimension_semantics<parallel>], iteration_bounds = array<i64: 1>, scalar_prefetch = 0 : i64, scratch_operands = 0 : i64, tpu.core_type = #tpu.core_type<tc>, window_params = [{transform_indices = @transform_0, window_bounds = array<i64: 2, 8, 32>}, {pipeline_mode = #tpu.pipeline_mode<synchronous>, transform_indices = @transform_1, window_bounds = array<i64: 1, 32>}, {pipeline_mode = #tpu.pipeline_mode<synchronous>, transform_indices = @transform_2, window_bounds = array<i64: 1, 32>}, {transform_indices = @transform_3, window_bounds = array<i64: 2, 8, 32>}]} {
    %c0 = arith.constant 0 : index
    %c0_0 = arith.constant 0 : index
    %c0_1 = arith.constant 0 : index
    %0 = vector.load %arg1[%c0, %c0_0, %c0_1] : memref<2x8x32xf32, #tpu.memory_space<vmem>>, vector<2x8x32xf32>
    %c0_2 = arith.constant 0 : index
    %c0_3 = arith.constant 0 : index
    %1 = vector.load %arg2[%c0_2, %c0_3] : memref<1x32xf32, #tpu.memory_space<vmem>>, vector<1x32xf32>
    %c0_4 = arith.constant 0 : index
    %c0_5 = arith.constant 0 : index
    %2 = vector.load %arg3[%c0_4, %c0_5] : memref<1x32xf32, #tpu.memory_space<vmem>>, vector<1x32xf32>
    %cst = arith.constant dense<0.000000e+00> : vector<2x8xf32>
    %3 = vector.multi_reduction <add>, %0, %cst [2] : vector<2x8x32xf32> to vector<2x8xf32>
    %4 = vector.shape_cast %3 : vector<2x8xf32> to vector<2x8x1xf32>
    %cst_6 = arith.constant 3.200000e+01 : f32
    %5 = vector.broadcast %cst_6 : f32 to vector<2x8x1xf32>
    %6 = arith.divf %4, %5 : vector<2x8x1xf32>
    %7 = vector.broadcast %6 : vector<2x8x1xf32> to vector<2x8x32xf32>
    %8 = arith.subf %0, %7 : vector<2x8x32xf32>
    %9 = arith.mulf %8, %8 : vector<2x8x32xf32>
    %cst_7 = arith.constant dense<0.000000e+00> : vector<2x8xf32>
    %10 = vector.multi_reduction <add>, %9, %cst_7 [2] : vector<2x8x32xf32> to vector<2x8xf32>
    %11 = vector.shape_cast %10 : vector<2x8xf32> to vector<2x8x1xf32>
    %cst_8 = arith.constant 3.200000e+01 : f32
    %12 = vector.broadcast %cst_8 : f32 to vector<2x8x1xf32>
    %13 = arith.divf %11, %12 : vector<2x8x1xf32>
    %14 = vector.broadcast %6 : vector<2x8x1xf32> to vector<2x8x32xf32>
    %15 = arith.subf %0, %14 : vector<2x8x32xf32>
    %cst_9 = arith.constant 9.99999974E-6 : f32
    %16 = vector.broadcast %cst_9 : f32 to vector<2x8x1xf32>
    %17 = arith.addf %13, %16 : vector<2x8x1xf32>
    %18 = math.rsqrt %17 : vector<2x8x1xf32>
    %19 = vector.broadcast %18 : vector<2x8x1xf32> to vector<2x8x32xf32>
    %20 = arith.mulf %15, %19 : vector<2x8x32xf32>
    %21 = vector.shape_cast %1 : vector<1x32xf32> to vector<1x1x32xf32>
    %22 = vector.broadcast %21 : vector<1x1x32xf32> to vector<2x8x32xf32>
    %23 = arith.mulf %20, %22 : vector<2x8x32xf32>
    %24 = vector.shape_cast %2 : vector<1x32xf32> to vector<1x1x32xf32>
    %25 = vector.broadcast %24 : vector<1x1x32xf32> to vector<2x8x32xf32>
    %26 = arith.addf %23, %25 : vector<2x8x32xf32>
    %c0_10 = arith.constant 0 : index
    %c0_11 = arith.constant 0 : index
    %c0_12 = arith.constant 0 : index
    %27 = vector.load %arg4[%c0_10, %c0_11, %c0_12] : memref<2x8x32xf32, #tpu.memory_space<vmem>>, vector<2x8x32xf32>
    tpu.vector_store %arg4[%c0_10, %c0_11, %c0_12], %26 {strides = array<i32>} : memref<2x8x32xf32, #tpu.memory_space<vmem>>, vector<2x8x32xf32>,
    return
  }
  func.func @transform_0(%arg0: i32) -> (i32, i32, i32) {
    %c0_i32 = arith.constant 0 : i32
    %c0_i32_0 = arith.constant 0 : i32
    %c0_i32_1 = arith.constant 0 : i32
    return %c0_i32, %arg0, %c0_i32_0 : i32, i32, i32
  }
  func.func @transform_1(%arg0: i32) -> (i32, i32) {
    %c0_i32 = arith.constant 0 : i32
    %c0_i32_0 = arith.constant 0 : i32
    %c0_i32_1 = arith.constant 0 : i32
    return %c0_i32, %c0_i32_0 : i32, i32
  }
  func.func @transform_2(%arg0: i32) -> (i32, i32) {
    %c0_i32 = arith.constant 0 : i32
    %c0_i32_0 = arith.constant 0 : i32
    %c0_i32_1 = arith.constant 0 : i32
    return %c0_i32, %c0_i32_0 : i32, i32
  }
  func.func @transform_3(%arg0: i32) -> (i32, i32, i32) {
    %c0_i32 = arith.constant 0 : i32
    %c0_i32_0 = arith.constant 0 : i32
    %c0_i32_1 = arith.constant 0 : i32
    return %c0_i32, %arg0, %c0_i32_0 : i32, i32, i32
  }
}

module attributes {stable_mosaic.version = 11 : i64} {
  func.func @_block_kernel(%arg0: i32, %arg1: memref<16x32xf32, #tpu.memory_space<vmem>>, %arg2: memref<16x32xf32, #tpu.memory_space<vmem>>, %arg3: memref<32x32xf32, #tpu.memory_space<vmem>>, %arg4: memref<1x32xf32, #tpu.memory_space<vmem>>, %arg5: memref<1x32xf32, #tpu.memory_space<vmem>>, %arg6: memref<1x32xf32, #tpu.memory_space<vmem>>, %arg7: memref<32x128xf32, #tpu.memory_space<vmem>>, %arg8: memref<1x128xf32, #tpu.memory_space<vmem>>, %arg9: memref<128x32xf32, #tpu.memory_space<vmem>>, %arg10: memref<1x32xf32, #tpu.memory_space<vmem>>, %arg11: memref<1x32xf32, #tpu.memory_space<vmem>>, %arg12: memref<1x32xf32, #tpu.memory_space<vmem>>, %arg13: memref<16x32xf32, #tpu.memory_space<vmem>>) attributes {dimension_semantics = [#tpu.dimension_semantics<parallel>], iteration_bounds = array<i64: 1>, scalar_prefetch = 0 : i64, scratch_operands = 0 : i64, tpu.core_type = #tpu.core_type<tc>, window_params = [{transform_indices = @transform_0, window_bounds = array<i64: 16, 32>}, {transform_indices = @transform_1, window_bounds = array<i64: 16, 32>}, {pipeline_mode = #tpu.pipeline_mode<synchronous>, transform_indices = @transform_2, window_bounds = array<i64: 32, 32>}, {pipeline_mode = #tpu.pipeline_mode<synchronous>, transform_indices = @transform_3, window_bounds = array<i64: 1, 32>}, {pipeline_mode = #tpu.pipeline_mode<synchronous>, transform_indices = @transform_4, window_bounds = array<i64: 1, 32>}, {pipeline_mode = #tpu.pipeline_mode<synchronous>, transform_indices = @transform_5, window_bounds = array<i64: 1, 32>}, {pipeline_mode = #tpu.pipeline_mode<synchronous>, transform_indices = @transform_6, window_bounds = array<i64: 32, 128>}, {pipeline_mode = #tpu.pipeline_mode<synchronous>, transform_indices = @transform_7, window_bounds = array<i64: 1, 128>}, {pipeline_mode = #tpu.pipeline_mode<synchronous>, transform_indices = @transform_8, window_bounds = array<i64: 128, 32>}, {pipeline_mode = #tpu.pipeline_mode<synchronous>, transform_indices = @transform_9, window_bounds = array<i64: 1, 32>}, {pipeline_mode = #tpu.pipeline_mode<synchronous>, transform_indices = @transform_10, window_bounds = array<i64: 1, 32>}, {pipeline_mode = #tpu.pipeline_mode<synchronous>, transform_indices = @transform_11, window_bounds = array<i64: 1, 32>}, {transform_indices = @transform_12, window_bounds = array<i64: 16, 32>}]} {
    %c0 = arith.constant 0 : index
    %c0_0 = arith.constant 0 : index
    %0 = vector.load %arg1[%c0, %c0_0] : memref<16x32xf32, #tpu.memory_space<vmem>>, vector<16x32xf32>
    %c0_1 = arith.constant 0 : index
    %c0_2 = arith.constant 0 : index
    %1 = vector.load %arg3[%c0_1, %c0_2] : memref<32x32xf32, #tpu.memory_space<vmem>>, vector<32x32xf32>
    %cst = arith.constant dense<0.000000e+00> : vector<16x32xf32>
    %2 = tpu.matmul %0, %1, %cst {dimension_numbers = #tpu.dot_dimension_numbers<[1], [0], [0], [1], [0, 0, 1, 1], [], []>} : vector<16x32xf32>, vector<32x32xf32>, vector<16x32xf32> -> vector<16x32xf32>
    %c0_3 = arith.constant 0 : index
    %c0_4 = arith.constant 0 : index
    %3 = vector.load %arg4[%c0_3, %c0_4] : memref<1x32xf32, #tpu.memory_space<vmem>>, vector<1x32xf32>
    %4 = vector.broadcast %3 : vector<1x32xf32> to vector<16x32xf32>
    %5 = arith.addf %2, %4 : vector<16x32xf32>
    %c0_5 = arith.constant 0 : index
    %c0_6 = arith.constant 0 : index
    %6 = vector.load %arg2[%c0_5, %c0_6] : memref<16x32xf32, #tpu.memory_space<vmem>>, vector<16x32xf32>
    %7 = arith.addf %5, %6 : vector<16x32xf32>
    %c0_7 = arith.constant 0 : index
    %c0_8 = arith.constant 0 : index
    %8 = vector.load %arg5[%c0_7, %c0_8] : memref<1x32xf32, #tpu.memory_space<vmem>>, vector<1x32xf32>
    %c0_9 = arith.constant 0 : index
    %c0_10 = arith.constant 0 : index
    %9 = vector.load %arg6[%c0_9, %c0_10] : memref<1x32xf32, #tpu.memory_space<vmem>>, vector<1x32xf32>
    %cst_11 = arith.constant dense<0.000000e+00> : vector<16xf32>
    %10 = vector.multi_reduction <add>, %7, %cst_11 [1] : vector<16x32xf32> to vector<16xf32>
    %11 = vector.shape_cast %10 : vector<16xf32> to vector<16x1xf32>
    %cst_12 = arith.constant 3.200000e+01 : f32
    %12 = vector.broadcast %cst_12 : f32 to vector<16x1xf32>
    %13 = arith.divf %11, %12 : vector<16x1xf32>
    %14 = vector.broadcast %13 : vector<16x1xf32> to vector<16x32xf32>
    %15 = arith.subf %7, %14 : vector<16x32xf32>
    %16 = arith.mulf %15, %15 : vector<16x32xf32>
    %cst_13 = arith.constant dense<0.000000e+00> : vector<16xf32>
    %17 = vector.multi_reduction <add>, %16, %cst_13 [1] : vector<16x32xf32> to vector<16xf32>
    %18 = vector.shape_cast %17 : vector<16xf32> to vector<16x1xf32>
    %cst_14 = arith.constant 3.200000e+01 : f32
    %19 = vector.broadcast %cst_14 : f32 to vector<16x1xf32>
    %20 = arith.divf %18, %19 : vector<16x1xf32>
    %21 = vector.broadcast %13 : vector<16x1xf32> to vector<16x32xf32>
    %22 = arith.subf %7, %21 : vector<16x32xf32>
    %cst_15 = arith.constant 9.99999974E-6 : f32
    %23 = vector.broadcast %cst_15 : f32 to vector<16x1xf32>
    %24 = arith.addf %20, %23 : vector<16x1xf32>
    %25 = math.rsqrt %24 : vector<16x1xf32>
    %26 = vector.broadcast %25 : vector<16x1xf32> to vector<16x32xf32>
    %27 = arith.mulf %22, %26 : vector<16x32xf32>
    %28 = vector.broadcast %8 : vector<1x32xf32> to vector<16x32xf32>
    %29 = arith.mulf %27, %28 : vector<16x32xf32>
    %30 = vector.broadcast %9 : vector<1x32xf32> to vector<16x32xf32>
    %31 = arith.addf %29, %30 : vector<16x32xf32>
    %c0_16 = arith.constant 0 : index
    %c0_17 = arith.constant 0 : index
    %32 = vector.load %arg7[%c0_16, %c0_17] : memref<32x128xf32, #tpu.memory_space<vmem>>, vector<32x128xf32>
    %cst_18 = arith.constant dense<0.000000e+00> : vector<16x128xf32>
    %33 = tpu.matmul %31, %32, %cst_18 {dimension_numbers = #tpu.dot_dimension_numbers<[1], [0], [0], [1], [0, 0, 1, 1], [], []>} : vector<16x32xf32>, vector<32x128xf32>, vector<16x128xf32> -> vector<16x128xf32>
    %c0_19 = arith.constant 0 : index
    %c0_20 = arith.constant 0 : index
    %34 = vector.load %arg8[%c0_19, %c0_20] : memref<1x128xf32, #tpu.memory_space<vmem>>, vector<1x128xf32>
    %35 = vector.broadcast %34 : vector<1x128xf32> to vector<16x128xf32>
    %36 = arith.addf %33, %35 : vector<16x128xf32>
    %cst_21 = arith.constant 0.000000e+00 : f32
    %37 = vector.broadcast %cst_21 : f32 to vector<16x128xf32>
    %38 = arith.maximumf %36, %37 : vector<16x128xf32>
    %c0_22 = arith.constant 0 : index
    %c0_23 = arith.constant 0 : index
    %39 = vector.load %arg9[%c0_22, %c0_23] : memref<128x32xf32, #tpu.memory_space<vmem>>, vector<128x32xf32>
    %cst_24 = arith.constant dense<0.000000e+00> : vector<16x32xf32>
    %40 = tpu.matmul %38, %39, %cst_24 {dimension_numbers = #tpu.dot_dimension_numbers<[1], [0], [0], [1], [0, 0, 1, 1], [], []>} : vector<16x128xf32>, vector<128x32xf32>, vector<16x32xf32> -> vector<16x32xf32>
    %c0_25 = arith.constant 0 : index
    %c0_26 = arith.constant 0 : index
    %41 = vector.load %arg10[%c0_25, %c0_26] : memref<1x32xf32, #tpu.memory_space<vmem>>, vector<1x32xf32>
    %42 = vector.broadcast %41 : vector<1x32xf32> to vector<16x32xf32>
    %43 = arith.addf %40, %42 : vector<16x32xf32>
    %44 = arith.addf %43, %31 : vector<16x32xf32>
    %c0_27 = arith.constant 0 : index
    %c0_28 = arith.constant 0 : index
    %45 = vector.load %arg11[%c0_27, %c0_28] : memref<1x32xf32, #tpu.memory_space<vmem>>, vector<1x32xf32>
    %c0_29 = arith.constant 0 : index
    %c0_30 = arith.constant 0 : index
    %46 = vector.load %arg12[%c0_29, %c0_30] : memref<1x32xf32, #tpu.memory_space<vmem>>, vector<1x32xf32>
    %cst_31 = arith.constant dense<0.000000e+00> : vector<16xf32>
    %47 = vector.multi_reduction <add>, %44, %cst_31 [1] : vector<16x32xf32> to vector<16xf32>
    %48 = vector.shape_cast %47 : vector<16xf32> to vector<16x1xf32>
    %cst_32 = arith.constant 3.200000e+01 : f32
    %49 = vector.broadcast %cst_32 : f32 to vector<16x1xf32>
    %50 = arith.divf %48, %49 : vector<16x1xf32>
    %51 = vector.broadcast %50 : vector<16x1xf32> to vector<16x32xf32>
    %52 = arith.subf %44, %51 : vector<16x32xf32>
    %53 = arith.mulf %52, %52 : vector<16x32xf32>
    %cst_33 = arith.constant dense<0.000000e+00> : vector<16xf32>
    %54 = vector.multi_reduction <add>, %53, %cst_33 [1] : vector<16x32xf32> to vector<16xf32>
    %55 = vector.shape_cast %54 : vector<16xf32> to vector<16x1xf32>
    %cst_34 = arith.constant 3.200000e+01 : f32
    %56 = vector.broadcast %cst_34 : f32 to vector<16x1xf32>
    %57 = arith.divf %55, %56 : vector<16x1xf32>
    %58 = vector.broadcast %50 : vector<16x1xf32> to vector<16x32xf32>
    %59 = arith.subf %44, %58 : vector<16x32xf32>
    %cst_35 = arith.constant 9.99999974E-6 : f32
    %60 = vector.broadcast %cst_35 : f32 to vector<16x1xf32>
    %61 = arith.addf %57, %60 : vector<16x1xf32>
    %62 = math.rsqrt %61 : vector<16x1xf32>
    %63 = vector.broadcast %62 : vector<16x1xf32> to vector<16x32xf32>
    %64 = arith.mulf %59, %63 : vector<16x32xf32>
    %65 = vector.broadcast %45 : vector<1x32xf32> to vector<16x32xf32>
    %66 = arith.mulf %64, %65 : vector<16x32xf32>
    %67 = vector.broadcast %46 : vector<1x32xf32> to vector<16x32xf32>
    %68 = arith.addf %66, %67 : vector<16x32xf32>
    %c0_36 = arith.constant 0 : index
    %c0_37 = arith.constant 0 : index
    %69 = vector.load %arg13[%c0_36, %c0_37] : memref<16x32xf32, #tpu.memory_space<vmem>>, vector<16x32xf32>
    tpu.vector_store %arg13[%c0_36, %c0_37], %68 {strides = array<i32>} : memref<16x32xf32, #tpu.memory_space<vmem>>, vector<16x32xf32>,
    return
  }
  func.func @transform_0(%arg0: i32) -> (i32, i32) {
    %c0_i32 = arith.constant 0 : i32
    %c0_i32_0 = arith.constant 0 : i32
    return %arg0, %c0_i32 : i32, i32
  }
  func.func @transform_1(%arg0: i32) -> (i32, i32) {
    %c0_i32 = arith.constant 0 : i32
    %c0_i32_0 = arith.constant 0 : i32
    return %arg0, %c0_i32 : i32, i32
  }
  func.func @transform_2(%arg0: i32) -> (i32, i32) {
    %c0_i32 = arith.constant 0 : i32
    %c0_i32_0 = arith.constant 0 : i32
    %c0_i32_1 = arith.constant 0 : i32
    return %c0_i32, %c0_i32_0 : i32, i32
  }
  func.func @transform_3(%arg0: i32) -> (i32, i32) {
    %c0_i32 = arith.constant 0 : i32
    %c0_i32_0 = arith.constant 0 : i32
    %c0_i32_1 = arith.constant 0 : i32
    return %c0_i32, %c0_i32_0 : i32, i32
  }
  func.func @transform_4(%arg0: i32) -> (i32, i32) {
    %c0_i32 = arith.constant 0 : i32
    %c0_i32_0 = arith.constant 0 : i32
    %c0_i32_1 = arith.constant 0 : i32
    return %c0_i32, %c0_i32_0 : i32, i32
  }
  func.func @transform_5(%arg0: i32) -> (i32, i32) {
    %c0_i32 = arith.constant 0 : i32
    %c0_i32_0 = arith.constant 0 : i32
    %c0_i32_1 = arith.constant 0 : i32
    return %c0_i32, %c0_i32_0 : i32, i32
  }
  func.func @transform_6(%arg0: i32) -> (i32, i32) {
    %c0_i32 = arith.constant 0 : i32
    %c0_i32_0 = arith.constant 0 : i32
    %c0_i32_1 = arith.constant 0 : i32
    return %c0_i32, %c0_i32_0 : i32, i32
  }
  func.func @transform_7(%arg0: i32) -> (i32, i32) {
    %c0_i32 = arith.constant 0 : i32
    %c0_i32_0 = arith.constant 0 : i32
    %c0_i32_1 = arith.constant 0 : i32
    return %c0_i32, %c0_i32_0 : i32, i32
  }
  func.func @transform_8(%arg0: i32) -> (i32, i32) {
    %c0_i32 = arith.constant 0 : i32
    %c0_i32_0 = arith.constant 0 : i32
    %c0_i32_1 = arith.constant 0 : i32
    return %c0_i32, %c0_i32_0 : i32, i32
  }
  func.func @transform_9(%arg0: i32) -> (i32, i32) {
    %c0_i32 = arith.constant 0 : i32
    %c0_i32_0 = arith.constant 0 : i32
    %c0_i32_1 = arith.constant 0 : i32
    return %c0_i32, %c0_i32_0 : i32, i32
  }
  func.func @transform_10(%arg0: i32) -> (i32, i32) {
    %c0_i32 = arith.constant 0 : i32
    %c0_i32_0 = arith.constant 0 : i32
    %c0_i32_1 = arith.constant 0 : i32
    return %c0_i32, %c0_i32_0 : i32, i32
  }
  func.func @transform_11(%arg0: i32) -> (i32, i32) {
    %c0_i32 = arith.constant 0 : i32
    %c0_i32_0 = arith.constant 0 : i32
    %c0_i32_1 = arith.constant 0 : i32
    return %c0_i32, %c0_i32_0 : i32, i32
  }
  func.func @transform_12(%arg0: i32) -> (i32, i32) {
    %c0_i32 = arith.constant 0 : i32
    %c0_i32_0 = arith.constant 0 : i32
    return %arg0, %c0_i32 : i32, i32
  }
}

</mosaic_0001>

<bundles_post_ra>
// kernel: transformer_encoder_forward.6
= control target key start
LH: loop header
LB: loop body
LE: loop exit
PB: predicated region body
PF: predicated region fallthrough
CT: control target
= control target key end

     0   :  { %vm18_vm0 = vcmask 261120   ;;  %s55_s0 = inlined_call_operand.vmem [shape: f32[2,8,32], index: 0, kind: input, shape index: {}]   ;;  %s56_s1 = inlined_call_operand.vmem [shape: f32[8,32], index: 1, kind: input, shape index: {}]   ;;  %s57_s2 = inlined_call_operand.vmem [shape: f32[2,8,32], index: 2, kind: output, shape index: {}]  }
   0x1   :  { %v11_v0 = vld [vmem:[%s55_s0] sm:$0xff]  ;;  %v12_v2 = vld [vmem:[%s55_s0 + $0x8] sm:$0xff] }
   0x2   :  { %v15_v1 = vld [vmem:[%s56_s1] sm:$0xff]  ;;  %v13_v3 = vmul.f32 5.656854, %v11_v0  ;;  %v14_v4 = vmul.f32 5.656854, %v12_v2 }
   0x4   :  { %v16_v5 = vadd.f32 %v15_v1, %v13_v3  ;;  %v17_v6 = vadd.f32 %v15_v1, %v14_v4 }
   0x6   :  { %19 = vst.msk [vmem:[%s57_s2] sm:$0xff] %vm18_vm0, %v16_v5  ;;  %20 = vst.msk [vmem:[%s57_s2 + $0x8] sm:$0xff] %vm18_vm0, %v17_v6 }

// kernel: transformer_encoder_forward.11
= control target key start
LH: loop header
LB: loop body
LE: loop exit
PB: predicated region body
PF: predicated region fallthrough
CT: control target
= control target key end

     0   :  { %vm18_vm0 = vcmask 261120   ;;  %s118_s0 = inlined_call_operand.vmem [shape: f32[2,8,32], index: 0, kind: input, shape index: {}]   ;;  %s119_s1 = inlined_call_operand.vmem [shape: f32[1,32], index: 1, kind: input, shape index: {}]   ;;  %s120_s2 = inlined_call_operand.vmem [shape: f32[1,32], index: 2, kind: input, shape index: {}]   ;;  %s121_s3 = inlined_call_operand.vmem [shape: f32[2,8,32], index: 3, kind: output, shape index: {}]  }
   0x1   :  { %v14_v0 = vld [vmem:[%s118_s0] sm:$0xff]  ;;  %v15_v1 = vld [vmem:[%s118_s0 + $0x8] sm:$0xff] }
   0x2   :  { %v19_v2 = vsel %vm18_vm0, %v14_v0, 0.0  ;;  %v22_v3 = vsel %vm18_vm0, %v15_v1, 0.0  ;;  %v68_v21 = vld [vmem:[%s119_s1] ss:$0 sm:$0xff] }
   0x3   :  { %20 = vadd.xlane.f32.xlu0 %v19_v2  ;;  %v69_v23 = vld [vmem:[%s120_s2] ss:$0 sm:$0xff] }
   0x7   :  { %23 = vadd.xlane.f32.xlu0 %v22_v3 }
  0x8c   :  { %v21_v4 = vpop.xlane.xlu0 %20 }
  0x8d   :  { %v26_v5 = vmul.f32 0.03125, %v21_v4 }
  0x8f   :  { %v28_v6 = vsub.f32 %v14_v0, %v26_v5 }
  0x90   :  { %v24_v7 = vpop.xlane.xlu0 %23 }
  0x91   :  { %v27_v8 = vmul.f32 0.03125, %v24_v7  ;;  %v30_v9 = vmul.f32 %v28_v6, %v28_v6 }
  0x93   :  { %v29_v10 = vsub.f32 %v15_v1, %v27_v8  ;;  %v32_v11 = vsel %vm18_vm0, %v30_v9, 0.0 }
  0x94   :  { %33 = vadd.xlane.f32.xlu1 %v32_v11 }
  0x95   :  { %v31_v12 = vmul.f32 %v29_v10, %v29_v10 }
  0x97   :  { %v35_v13 = vsel %vm18_vm0, %v31_v12, 0.0 }
  0x98   :  { %36 = vadd.xlane.f32.xlu1 %v35_v13 }
 0x11d   :  { %v34_v14 = vpop.xlane.xlu1 %33 }
 0x11e   :  { %v38_v15 = vmul.f32 0.03125, %v34_v14 }
 0x120   :  { %v40_v16 = vadd.f32 1e-05, %v38_v15 }
 0x121   :  { %v37_v17 = vpop.xlane.xlu1 %36 }
 0x122   :  { %70 = vrsqrt.f32 %v40_v16  ;;  %v39_v18 = vmul.f32 0.03125, %v37_v17 }
 0x124   :  { %v41_v19 = vadd.f32 1e-05, %v39_v18 }
 0x126   :  { %72 = vrsqrt.f32 %v41_v19 }
 0x12f   :  { %v71_v20 = vpop.eup %70 }
 0x130   :  { %v44_v22 = vmul.f32 %v71_v20, %v28_v6 }
 0x132   :  { %v52_v24 = vmul.f32 %v68_v21, %v44_v22 }
 0x133   :  { %v73_v25 = vpop.eup %72 }
 0x134   :  { %v60_v26 = vadd.f32 %v69_v23, %v52_v24  ;;  %v45_v27 = vmul.f32 %v73_v25, %v29_v10 }
 0x136   :  { %62 = vst.msk [vmem:[%s121_s3] sm:$0xff] %vm18_vm0, %v60_v26  ;;  %v53_v28 = vmul.f32 %v68_v21, %v45_v27 }
 0x138   :  { %v61_v29 = vadd.f32 %v69_v23, %v53_v28 }
 0x13a   :  { %63 = vst.msk [vmem:[%s121_s3 + $0x8] sm:$0xff] %vm18_vm0, %v61_v29 }

// kernel: transformer_encoder_forward.8
= control target key start
LH: loop header
LB: loop body
LE: loop exit
PB: predicated region body
PF: predicated region fallthrough
CT: control target
= control target key end

     0   :  { %vm54_vm0 = vcmask 261120   ;;  %s735_s2 = inlined_call_operand.vmem [shape: f32[32,32], index: 2, kind: input, shape index: {}]   ;;  %s736_s0 = inlined_call_operand.vmem [shape: f32[16,32], index: 0, kind: input, shape index: {}]   ;;  %s737_s3 = inlined_call_operand.vmem [shape: f32[1,32], index: 3, kind: input, shape index: {}]   ;;  %s738_s1 = inlined_call_operand.vmem [shape: f32[16,32], index: 1, kind: input, shape index: {}]   ;;  %s739_s6 = inlined_call_operand.vmem [shape: f32[32,128], index: 6, kind: input, shape index: {}]   ;;  %s740_s8 = inlined_call_operand.vmem [shape: f32[128,32], index: 8, kind: input, shape index: {}]   ;;  %s741_s4 = inlined_call_operand.vmem [shape: f32[1,32], index: 4, kind: input, shape index: {}]   ;;  %s742_s5 = inlined_call_operand.vmem [shape: f32[1,32], index: 5, kind: input, shape index: {}]   ;;  %s743_s7 = inlined_call_operand.vmem [shape: f32[1,128], index: 7, kind: input, shape index: {}]   ;;  %s744_s9 = inlined_call_operand.vmem [shape: f32[1,32], index: 9, kind: input, shape index: {}]   ;;  %s745_s10 = inlined_call_operand.vmem [shape: f32[1,32], index: 10, kind: input, shape index: {}]   ;;  %s746_s11 = inlined_call_operand.vmem [shape: f32[1,32], index: 11, kind: input, shape index: {}]   ;;  %s747_s12 = inlined_call_operand.vmem [shape: f32[16,32], index: 12, kind: output, shape index: {}]  }
   0x1   :  { %v46_v0 = vld [vmem:[%s735_s2 + $0x18] sm:$0xff]  ;;  %v45_v1 = vld [vmem:[%s735_s2 + $0x10] sm:$0xff]  ;;  %v41_v2 = vld [vmem:[%s736_s0] sm:$0xff] }
   0x2   :  { %470 = vmatprep.subr.mxu1 %v46_v0  ;;  %v44_v3 = vld [vmem:[%s735_s2 + $0x8] sm:$0xff]  ;;  %478 = vmatprep.mubr.msk.f32.mxu1 %vm54_vm0, %v41_v2  ;;  %v43_v4 = vld [vmem:[%s735_s2] sm:$0xff]  ;;  %v188_v27 = vld [vmem:[%s739_s6 + $0x18] sm:$0xff] }
   0x3   :  { %471 = vmatpush3.msra.mxu1 %v46_v0  ;;  %v42_v5 = vld [vmem:[%s736_s0 + $0x8] sm:$0xff]  ;;  %v429_v7 = vld [vmem:[%s737_s3] ss:$0 sm:$0xff]  ;;  %v187_v28 = vld [vmem:[%s739_s6 + $0x10] sm:$0xff] }
   0x4   :  { %472 = vmatprep.subr.mxu1 %v45_v1  ;;  %v136_v9 = vld [vmem:[%s738_s1] sm:$0xff]  ;;  %v137_v12 = vld [vmem:[%s738_s1 + $0x8] sm:$0xff]  ;;  %v294_v31 = vld [vmem:[%s740_s8 + $0x78] sm:$0xff] }
   0x5   :  { %473 = vmatpush3.msra.mxu1 %v45_v1  ;;  %v186_v29 = vld [vmem:[%s739_s6 + $0x8] sm:$0xff]  ;;  %v185_v30 = vld [vmem:[%s739_s6] sm:$0xff]  ;;  %v293_v32 = vld [vmem:[%s740_s8 + $0x70] sm:$0xff]  ;;  %492 = vmatprep.subr.mxu0 %v294_v31 }
   0x6   :  { %474 = vmatprep.subr.mxu1 %v44_v3  ;;  %493 = vmatpush3.msra.mxu0 %v294_v31  ;;  %v292_v33 = vld [vmem:[%s740_s8 + $0x68] sm:$0xff]  ;;  %v291_v34 = vld [vmem:[%s740_s8 + $0x60] sm:$0xff]  ;;  %v290_v35 = vld [vmem:[%s740_s8 + $0x58] sm:$0xff] }
   0x7   :  { %475 = vmatpush3.msra.mxu1 %v44_v3  ;;  %494 = vmatprep.subr.mxu0 %v293_v32  ;;  %v289_v36 = vld [vmem:[%s740_s8 + $0x50] sm:$0xff]  ;;  %v288_v37 = vld [vmem:[%s740_s8 + $0x48] sm:$0xff]  ;;  %v287_v38 = vld [vmem:[%s740_s8 + $0x40] sm:$0xff] }
   0x8   :  { %476 = vmatprep.subr.mxu1 %v43_v4  ;;  %495 = vmatpush3.msra.mxu0 %v293_v32  ;;  %v286_v39 = vld [vmem:[%s740_s8 + $0x38] sm:$0xff]  ;;  %v285_v40 = vld [vmem:[%s740_s8 + $0x30] sm:$0xff]  ;;  %v284_v41 = vld [vmem:[%s740_s8 + $0x28] sm:$0xff] }
   0x9   :  { %477 = vmatpush3.msra.mxu1 %v43_v4  ;;  %496 = vmatprep.subr.mxu0 %v292_v33  ;;  %v283_v42 = vld [vmem:[%s740_s8 + $0x20] sm:$0xff]  ;;  %v282_v59 = vld [vmem:[%s740_s8 + $0x18] sm:$0xff]  ;;  %v281_v60 = vld [vmem:[%s740_s8 + $0x10] sm:$0xff] }
   0xa   :  { %479 = vmatmul.mubr.msk.f32.vlgmr.msra.gmra.mxu1 %vm54_vm0, %v42_v5  ;;  %481 = vmatprep.subr.mxu1 %v188_v27  ;;  %v432_v50 = vld [vmem:[%s741_s4] ss:$0 sm:$0xff]  ;;  %v280_v61 = vld [vmem:[%s740_s8 + $0x8] sm:$0xff] }
   0xb   :  { %482 = vmatpush3.msra.mxu1 %v188_v27  ;;  %497 = vmatpush3.msra.mxu0 %v292_v33  ;;  %v433_v52 = vld [vmem:[%s742_s5] ss:$0 sm:$0xff] }
   0xc   :  { %483 = vmatprep.subr.mxu1 %v187_v28  ;;  %498 = vmatprep.subr.mxu0 %v291_v34  ;;  %v279_v62 = vld [vmem:[%s740_s8] sm:$0xff] }
   0xd   :  { %484 = vmatpush3.msra.mxu1 %v187_v28  ;;  %499 = vmatpush3.msra.mxu0 %v291_v34  ;;  %v434_v63 = vld [vmem:[%s743_s7] ss:$0 sm:$0xff] }
   0xe   :  { %485 = vmatprep.subr.mxu1 %v186_v29  ;;  %500 = vmatprep.subr.mxu0 %v290_v35  ;;  %v438_v32 = vld [vmem:[%s745_s10] ss:$0 sm:$0xff] }
   0xf   :  { %486 = vmatpush3.msra.mxu1 %v186_v29  ;;  %501 = vmatpush3.msra.mxu0 %v290_v35  ;;  %v439_v35 = vld [vmem:[%s746_s11] ss:$0 sm:$0xff] }
  0x10   :  { %487 = vmatprep.subr.mxu1 %v185_v30  ;;  %502 = vmatprep.subr.mxu0 %v289_v36 }
  0x11   :  { %488 = vmatpush3.msra.mxu1 %v185_v30  ;;  %503 = vmatpush3.msra.mxu0 %v289_v36 }
  0x12   :  { %504 = vmatprep.subr.mxu0 %v288_v37 }
  0x13   :  { %505 = vmatpush3.msra.mxu0 %v288_v37 }
  0x14   :  { %506 = vmatprep.subr.mxu0 %v287_v38 }
  0x15   :  { %507 = vmatpush3.msra.mxu0 %v287_v38 }
  0x16   :  { %508 = vmatprep.subr.mxu0 %v286_v39 }
  0x17   :  { %509 = vmatpush3.msra.mxu0 %v286_v39 }
  0x18   :  { %510 = vmatprep.subr.mxu0 %v285_v40 }
  0x19   :  { %511 = vmatpush3.msra.mxu0 %v285_v40 }
  0x1a   :  { %512 = vmatprep.subr.mxu0 %v284_v41 }
  0x1b   :  { %513 = vmatpush3.msra.mxu0 %v284_v41 }
  0x1c   :  { %514 = vmatprep.subr.mxu0 %v283_v42 }
  0x1d   :  { %515 = vmatpush3.msra.mxu0 %v283_v42 }
  0x1e   :  { %516 = vmatprep.subr.mxu0 %v282_v59 }
  0x1f   :  { %517 = vmatpush3.msra.mxu0 %v282_v59 }
  0x20   :  { %518 = vmatprep.subr.mxu0 %v281_v60 }
  0x21   :  { %519 = vmatpush3.msra.mxu0 %v281_v60 }
  0x22   :  { %520 = vmatprep.subr.mxu0 %v280_v61 }
  0x23   :  { %521 = vmatpush3.msra.mxu0 %v280_v61 }
  0x24   :  { %522 = vmatprep.subr.mxu0 %v279_v62 }
  0x25   :  { %523 = vmatpush3.msra.mxu0 %v279_v62 }
  0xca   :  { %v480_v6 = vpop.f32.mrf.mxu1 }
  0xcb   :  { %v133_v10 = vadd.f32 %v480_v6, %v429_v7  ;;  %v437_v6 = vld [vmem:[%s744_s9] ss:$0 sm:$0xff] }
  0xcc   :  { %v127_v8 = vpop.f32.mrf.mxu1 }
  0xcd   :  { %v128_v11 = vadd.f32 %v429_v7, %v127_v8  ;;  %v139_v15 = vadd.f32 %v137_v12, %v133_v10 }
  0xcf   :  { %v138_v13 = vadd.f32 %v136_v9, %v128_v11  ;;  %v145_v16 = vsel %vm54_vm0, %v139_v15, 0.0 }
  0xd1   :  { %v142_v14 = vsel %vm54_vm0, %v138_v13, 0.0 }
  0xd2   :  { %143 = vadd.xlane.f32.xlu0 %v142_v14 }
  0xd6   :  { %146 = vadd.xlane.f32.xlu0 %v145_v16 }
 0x15b   :  { %v144_v17 = vpop.xlane.xlu0 %143 }
 0x15c   :  { %v149_v18 = vmul.f32 0.03125, %v144_v17 }
 0x15e   :  { %v631_v19 = vsub.f32 %v138_v13, %v149_v18 }
 0x15f   :  { %v147_v20 = vpop.xlane.xlu0 %146 }
 0x160   :  { %v150_v21 = vmul.f32 0.03125, %v147_v20  ;;  %v153_v22 = vmul.f32 %v631_v19, %v631_v19 }
 0x162   :  { %v635_v23 = vsub.f32 %v139_v15, %v150_v21  ;;  %v155_v24 = vsel %vm54_vm0, %v153_v22, 0.0 }
 0x163   :  { %156 = vadd.xlane.f32.xlu1 %v155_v24 }
 0x164   :  { %v154_v25 = vmul.f32 %v635_v23, %v635_v23 }
 0x166   :  { %v158_v26 = vsel %vm54_vm0, %v154_v25, 0.0 }
 0x167   :  { %159 = vadd.xlane.f32.xlu1 %v158_v26 }
 0x1ec   :  { %v157_v43 = vpop.xlane.xlu1 %156 }
 0x1ed   :  { %v161_v44 = vmul.f32 0.03125, %v157_v43 }
 0x1ef   :  { %v163_v45 = vadd.f32 1e-05, %v161_v44 }
 0x1f0   :  { %v160_v46 = vpop.xlane.xlu1 %159 }
 0x1f1   :  { %527 = vrsqrt.f32 %v163_v45  ;;  %v162_v47 = vmul.f32 0.03125, %v160_v46 }
 0x1f3   :  { %v164_v48 = vadd.f32 1e-05, %v162_v47 }
 0x1f5   :  { %529 = vrsqrt.f32 %v164_v48 }
 0x1fe   :  { %v528_v49 = vpop.eup %527 }
 0x1ff   :  { %v167_v51 = vmul.f32 %v528_v49, %v631_v19 }
 0x201   :  { %v175_v53 = vmul.f32 %v432_v50, %v167_v51 }
 0x202   :  { %v530_v54 = vpop.eup %529 }
 0x203   :  { %v168_v55 = vmul.f32 %v530_v54, %v635_v23  ;;  %v183_v56 = vadd.f32 %v433_v52, %v175_v53 }
 0x205   :  { %v176_v57 = vmul.f32 %v432_v50, %v168_v55  ;;  %489 = vmatprep.mubr.msk.f32.mxu1 %vm54_vm0, %v183_v56 }
 0x207   :  { %v184_v58 = vadd.f32 %v433_v52, %v176_v57 }
 0x209   :  { %490 = vmatmul.mubr.msk.f32.vlgmr.msra.gmra.mxu1 %vm54_vm0, %v184_v58 }
 0x2c9   :  { %v491_v0 = vpop.f32.mrf.mxu1 }
 0x2ca   :  { %v274_v1 = vadd.f32 %v491_v0, %v434_v63 }
 0x2cb   :  { %v268_v2 = vpop.f32.mrf.mxu1 }
 0x2cc   :  { %v269_v3 = vadd.f32 %v434_v63, %v268_v2  ;;  %v278_v5 = vmax.f32 %v274_v1, 0.0 }
 0x2ce   :  { %v277_v4 = vmax.f32 %v269_v3, 0.0 }
 0x2d0   :  { %524 = vmatprep.mubr.f32.mxu0 %v277_v4 }
 0x2d1   :  { %525 = vmatmul.mubr.f32.vlgmr.msra.gmra.mxu0 %v278_v5 }
 0x391   :  { %v526_v7 = vpop.f32.mrf.mxu0 }
 0x392   :  { %v374_v8 = vadd.f32 %v526_v7, %v437_v6 }
 0x393   :  { %v368_v9 = vpop.f32.mrf.mxu0 }
 0x394   :  { %v369_v10 = vadd.f32 %v437_v6, %v368_v9  ;;  %v378_v11 = vadd.f32 %v374_v8, %v184_v58 }
 0x396   :  { %v384_v12 = vsel %vm54_vm0, %v378_v11, 0.0  ;;  %v377_v13 = vadd.f32 %v369_v10, %v183_v56 }
 0x397   :  { %385 = vadd.xlane.f32.xlu1 %v384_v12 }
 0x398   :  { %v381_v14 = vsel %vm54_vm0, %v377_v13, 0.0 }
 0x399   :  { %382 = vadd.xlane.f32.xlu0 %v381_v14 }
 0x420   :  { %v386_v15 = vpop.xlane.xlu1 %385 }
 0x421   :  { %v388_v16 = vmul.f32 0.03125, %v386_v15 }
 0x422   :  { %v383_v17 = vpop.xlane.xlu0 %382 }
 0x423   :  { %v390_v18 = vsub.f32 %v378_v11, %v388_v16  ;;  %v387_v19 = vmul.f32 0.03125, %v383_v17 }
 0x425   :  { %v389_v20 = vsub.f32 %v377_v13, %v387_v19  ;;  %v392_v21 = vmul.f32 %v390_v18, %v390_v18 }
 0x427   :  { %v396_v22 = vsel %vm54_vm0, %v392_v21, 0.0  ;;  %v391_v23 = vmul.f32 %v389_v20, %v389_v20 }
 0x428   :  { %397 = vadd.xlane.f32.xlu1 %v396_v22 }
 0x429   :  { %v393_v24 = vsel %vm54_vm0, %v391_v23, 0.0 }
 0x42a   :  { %394 = vadd.xlane.f32.xlu0 %v393_v24 }
 0x4b1   :  { %v398_v25 = vpop.xlane.xlu1 %397 }
 0x4b2   :  { %v400_v26 = vmul.f32 0.03125, %v398_v25 }
 0x4b3   :  { %v395_v27 = vpop.xlane.xlu0 %394 }
 0x4b4   :  { %v402_v28 = vadd.f32 1e-05, %v400_v26  ;;  %v399_v29 = vmul.f32 0.03125, %v395_v27 }
 0x4b6   :  { %531 = vrsqrt.f32 %v402_v28  ;;  %v401_v30 = vadd.f32 1e-05, %v399_v29 }
 0x4b8   :  { %533 = vrsqrt.f32 %v401_v30 }
 0x4c3   :  { %v532_v31 = vpop.eup %531 }
 0x4c4   :  { %v406_v33 = vmul.f32 %v532_v31, %v390_v18 }
 0x4c5   :  { %v534_v34 = vpop.eup %533 }
 0x4c6   :  { %v414_v36 = vmul.f32 %v438_v32, %v406_v33  ;;  %v405_v37 = vmul.f32 %v534_v34, %v389_v20 }
 0x4c8   :  { %v422_v38 = vadd.f32 %v439_v35, %v414_v36  ;;  %v413_v39 = vmul.f32 %v438_v32, %v405_v37 }
 0x4ca   :  { %424 = vst.msk [vmem:[%s747_s12 + $0x8] sm:$0xff] %vm54_vm0, %v422_v38  ;;  %v421_v40 = vadd.f32 %v439_v35, %v413_v39 }
 0x4cc   :  { %423 = vst.msk [vmem:[%s747_s12] sm:$0xff] %vm54_vm0, %v421_v40 }

// kernel: transformer_encoder_forward.7
= control target key start
LH: loop header
LB: loop body
LE: loop exit
PB: predicated region body
PF: predicated region fallthrough
CT: control target
= control target key end

     0   :  { %s1363_s12 = smov 0   ;;  %s1365_s13 = smov 0   ;;  %s1494_s0 = inlined_call_operand.vmem [shape: f32[2,8,32], index: 0, kind: input, shape index: {}]   ;;  %s1495_s1 = inlined_call_operand.vmem [shape: f32[32,96], index: 1, kind: input, shape index: {}]   ;;  %s1496_s2 = inlined_call_operand.vmem [shape: f32[1,96], index: 2, kind: input, shape index: {}]   ;;  %s1497_s3 = inlined_call_operand.vmem [shape: f32[2,8,32], index: 3, kind: output, shape index: {}]  }
   0x1   :  { %s1367_s14 = smov 0  }
   0x2 LB: > { %s25_s15 = sadd.s32 1, %s1328_s13  ;;  %p1153_p0 = scmp.ge.s32.totalorder %s1332_s14, 1  ;;  %s1332_s14 = sphi %s1367_s14, %s13_s14   ;;  %s1328_s13 = sphi %s1365_s13, %s1499_s13   ;;  %s1324_s12 = sphi %s1363_s12, %s1498_s12  }
   0x3   : > { %p27_p1 = scmp.ge.s32.totalorder %s25_s15, 2  ;;  %p150_p2 = scmp.lt.s32.totalorder %s1332_s14, 3 }
   0x5   : > { %s1501_s15 = smov (%p27_p1, %s25_s15), 0  ;;  %p151_p3 = pnand %p1153_p0, %p150_p2 }
   0x6   : > { %s1334_s20 = smov (!%p151_p3), 96   ;;  %p175_p4 = scmp.lt.s32.totalorder (!%p151_p3), %s1324_s12, 1 }
   0x7   : > { %154 = sbr.rel (%p151_p3) target bundleno = 1280 (0x500), region = 32  ;;  %s1337_s4 = smov (!%p151_p3), 120  }
   0x8   : > { %s1338_s5 = smov (!%p151_p3), 112   ;;  %s1339_s6 = smov (!%p151_p3), 104  }
   0x9   : > { %s1340_s10 = smov (!%p151_p3), 8   ;;  %s1341_s11 = smov (!%p151_p3), 16  }
   0xa   : > { %s1342_s16 = smov (!%p151_p3), 24  }
   0xc   : > { %v195_v0 = vld [vmem:[%s1495_s1 + $0x18] sm:$0xff]  ;;  %v193_v1 = vld [vmem:[%s1495_s1 + $0x8] sm:$0xff]  ;;  %v194_v2 = vld [vmem:[%s1495_s1 + $0x10] sm:$0xff]  ;;  %v1335_v4 = vmov 0.0   ;;  %vm1336_vm0 = vmmov 0   ;;  %s1503_s12 = smov (!%p175_p4, %s1324_s12), 1 }
   0xd   : > { %211 = vrot.lane.b32.xlu0 %v195_v0, %s1334_s20  ;;  %207 = vrot.lane.b32.xlu1 %v193_v1, %s1334_s20  ;;  %v192_v3 = vld [vmem:[%s1495_s1] sm:$0xff]  ;;  %s1154_s25 = sshll.u32 %s1503_s12, 3  ;;  %vm220_vm1 = vcmask 261120   ;;  %vm388_vm2 = vcmask 64512   ;;  %vm724_vm3 = vcmask 130112   ;;  %vm899_vm4 = vcmask 195712  }
   0xe   : > { %1199 = vmatprep.subr.mxu0 %v1335_v4  ;;  %1210 = vmatprep.subr.mxu1 %v1335_v4  ;;  %v1172_v5 = vld [vmem:[%s1496_s2] ss:$0 sm:$0xff]  ;;  %s178_s30 = scalar_lea.vmem %s1494_s0, %s1154_s25  ;;  %s185_s9 = scalar_lea.vmem %s1497_s3, %s1154_s25  ;;  %vm1074_vm5 = vcmask 261312  }
   0xf   : > { %1211 = vmatpush3.msra.mxu1 %v195_v0  ;;  %1207 = vmatprep.mubr.msk.f32.mxu0 %vm1336_vm0, %v1335_v4  ;;  %v191_v6 = vld [vmem:[%s178_s30] sm:$0xff] }
  0x10   : > { %1212 = vmatprep.subr.mxu1 %v1335_v4  ;;  %1218 = vmatprep.mubr.msk.f32.mxu1 %vm1336_vm0, %v1335_v4 }
  0x11   : > { %209 = vrot.lane.b32.xlu0 %v194_v2, %s1334_s20  ;;  %205 = vrot.lane.b32.xlu1 %v192_v3, %s1334_s20 }
  0x12   : > { %1213 = vmatpush3.msra.mxu1 %v194_v2 }
  0x13   : > { %1214 = vmatprep.subr.mxu1 %v1335_v4 }
  0x14   : > { %1215 = vmatpush3.msra.mxu1 %v193_v1 }
  0x15   : > { %1216 = vmatprep.subr.mxu1 %v1335_v4  ;;  %217 = vrot.lane.b32.xlu0 %v1172_v5, %s1334_s20 }
  0x16   : > { %1217 = vmatpush3.msra.mxu1 %v192_v3 }
  0x17   : > { %1219 = vmatmul.mubr.msk.f32.vlgmr.msra.gmra.mxu1 %vm220_vm1, %v191_v6  ;;  %1226 = vmatprep.subr.mxu1 %v1335_v4 }
  0x18   : > { %1228 = vmatprep.mubr.msk.f32.mxu1 %vm1336_vm0, %v1335_v4 }
  0x7f   : > { %v212_v7 = vpop.permute.xlu0 %211  ;;  %v208_v8 = vpop.permute.xlu1 %207 }
  0x80   : > { %1200 = vmatpush3.msra.mxu0 %v212_v7 }
  0x81   : > { %1201 = vmatprep.subr.mxu0 %v1335_v4 }
  0x83   : > { %v210_v9 = vpop.permute.xlu0 %209  ;;  %v206_v10 = vpop.permute.xlu1 %205 }
  0x84   : > { %1202 = vmatpush3.msra.mxu0 %v210_v9 }
  0x85   : > { %1203 = vmatprep.subr.mxu0 %v1335_v4 }
  0x86   : > { %1204 = vmatpush3.msra.mxu0 %v208_v8 }
  0x87   : > { %1205 = vmatprep.subr.mxu0 %v1335_v4  ;;  %v218_v14 = vpop.permute.xlu0 %217 }
  0x88   : > { %1206 = vmatpush3.msra.mxu0 %v206_v10 }
  0x89   : > { %1208 = vmatmul.mubr.msk.f32.vlgmr.msra.gmra.mxu0 %vm220_vm1, %v191_v6  ;;  %1221 = vmatprep.subr.mxu0 %v1335_v4 }
  0x8a   : > { %1223 = vmatprep.mubr.msk.f32.mxu0 %vm1336_vm0, %v1335_v4 }
  0xd7   : > { %v383_v11 = vpop.f32.mrf.mxu1 }
  0xd8   : > { %v384_v12 = vadd.f32 %v1172_v5, %v383_v11 }
  0xd9   : > { %v1220_v13 = vpop.f32.mrf.mxu1 }
  0xda   : > { %552 = vrot.lane.b32.xlu0 %v384_v12, %s1337_s4 }
  0xde   : > { %727 = vrot.lane.b32.xlu0 %v384_v12, %s1338_s5 }
  0xe2   : > { %902 = vrot.lane.b32.xlu0 %v384_v12, %s1339_s6 }
 0x149   : > { %v290_v15 = vpop.f32.mrf.mxu0 }
 0x14a   : > { %v291_v16 = vadd.f32 %v290_v15, %v218_v14 }
 0x14b   : > { %v1209_v17 = vpop.f32.mrf.mxu0 }
 0x14c   : > { %294 = vst.msk [vmem:[#allocation2] sm:$0xff] %vm220_vm1, %v291_v16  ;;  %v553_v19 = vpop.permute.xlu0 %552 }
 0x150   : > { %v728_v22 = vpop.permute.xlu0 %727 }
 0x153   : > { %v551_v18 = vld [vmem:[#allocation2] sm:$0xff] }
 0x154   : > { %555 = vrot.lane.b32.xlu1 %v551_v18, %s1337_s4  ;;  %1222 = vmatpush3.xpose.msk.msra.mxu0 %vm388_vm2, %v551_v18  ;;  %v903_v24 = vpop.permute.xlu0 %902 }
 0x155   : > { %1231 = vmatprep.subr.mxu0 %v1335_v4 }
 0x157   : > { %1224 = vmatmul.mubr.msk.f32.vlgmr.msra.gmra.mxu0 %vm388_vm2, %v384_v12 }
 0x158   : > { %730 = vrot.lane.b32.xlu1 %v551_v18, %s1338_s5  ;;  %1233 = vmatprep.mubr.msk.f32.mxu0 %vm1336_vm0, %v1335_v4 }
 0x15c   : > { %905 = vrot.lane.b32.xlu1 %v551_v18, %s1339_s6 }
 0x1c6   : > { %v556_v20 = vpop.permute.xlu1 %555 }
 0x1c7   : > { %1232 = vmatpush3.xpose.msk.msra.mxu0 %vm388_vm2, %v556_v20 }
 0x1c8   : > { %1241 = vmatprep.subr.mxu0 %v1335_v4 }
 0x1ca   : > { %v731_v21 = vpop.permute.xlu1 %730  ;;  %1234 = vmatmul.mubr.msk.f32.vlgmr.msra.gmra.mxu0 %vm388_vm2, %v553_v19 }
 0x1cb   : > { %1242 = vmatpush3.xpose.msk.msra.mxu0 %vm388_vm2, %v731_v21  ;;  %1243 = vmatprep.mubr.msk.f32.mxu0 %vm1336_vm0, %v1335_v4 }
 0x1cc   : > { %1251 = vmatprep.subr.mxu0 %v1335_v4 }
 0x1ce   : > { %v906_v23 = vpop.permute.xlu1 %905  ;;  %1244 = vmatmul.mubr.msk.f32.vlgmr.msra.gmra.mxu0 %vm388_vm2, %v728_v22 }
 0x1cf   : > { %1252 = vmatpush3.xpose.msk.msra.mxu0 %vm388_vm2, %v906_v23  ;;  %1253 = vmatprep.mubr.msk.f32.mxu0 %vm1336_vm0, %v1335_v4 }
 0x1d2   : > { %1254 = vmatmul.mubr.msk.f32.vlgmr.msra.gmra.mxu0 %vm388_vm2, %v903_v24 }
 0x217   : > { %v461_v25 = vpop.f32.mrf.mxu0 }
 0x218   : > { %v465_v26 = vsel %vm388_vm2, %v461_v25, -inf }
 0x219   : > { %466 = vmax.xlane.f32.xlu1 %v465_v26  ;;  %v1225_v27 = vpop.f32.mrf.mxu0 }
 0x28a   : > { %v627_v28 = vpop.f32.mrf.mxu0 }
 0x28b   : > { %v631_v29 = vsel %vm388_vm2, %v627_v28, -inf }
 0x28c   : > { %632 = vmax.xlane.f32.xlu0 %v631_v29  ;;  %v1235_v30 = vpop.f32.mrf.mxu0 }
 0x28e   : > { %v802_v31 = vpop.f32.mrf.mxu0 }
 0x28f   : > { %v806_v32 = vsel %vm388_vm2, %v802_v31, -inf }
 0x290   : > { %807 = vmax.xlane.f32.xlu0 %v806_v32  ;;  %v1245_v33 = vpop.f32.mrf.mxu0 }
 0x292   : > { %v977_v34 = vpop.f32.mrf.mxu0 }
 0x293   : > { %v981_v35 = vsel %vm388_vm2, %v977_v34, -inf }
 0x294   : > { %982 = vmax.xlane.f32.xlu1 %v981_v35  ;;  %v1255_v36 = vpop.f32.mrf.mxu0 }
 0x2a2   : > { %v467_v37 = vpop.xlane.xlu1 %466 }
 0x2a3   : > { %v468_v38 = vsub.f32 %v461_v25, %v467_v37 }
 0x2a5   : > { %v469_v39 = vmul.f32 1.442695, %v468_v38 }
 0x2a6   : > { %296 = vrot.lane.b32.xlu0 %v291_v16, %s1334_s20 }
 0x2a7   : > { %1294 = vpow2.f32 %v469_v39 }
 0x2b4   : > { %v1295_v40 = vpop.eup %1294 }
 0x2b5   : > { %v471_v41 = vsel %vm388_vm2, %v1295_v40, 0.0 }
 0x2b6   : > { %472 = vadd.xlane.f32.xlu1 %v471_v41 }
 0x315   : > { %v633_v42 = vpop.xlane.xlu0 %632 }
 0x316   : > { %v634_v43 = vsub.f32 %v627_v28, %v633_v42 }
 0x318   : > { %v635_v44 = vmul.f32 1.442695, %v634_v43 }
 0x319   : > { %v808_v45 = vpop.xlane.xlu0 %807 }
 0x31a   : > { %1296 = vpow2.f32 %v635_v44  ;;  %v809_v46 = vsub.f32 %v802_v31, %v808_v45 }
 0x31c   : > { %v810_v47 = vmul.f32 1.442695, %v809_v46 }
 0x31d   : > { %v297_v48 = vpop.permute.xlu0 %296  ;;  %v983_v49 = vpop.xlane.xlu1 %982 }
 0x31e   : > { %1298 = vpow2.f32 %v810_v47  ;;  %299 = vst.msk [vmem:[#allocation3] sm:$0xff] %vm220_vm1, %v297_v48  ;;  %v984_v50 = vsub.f32 %v977_v34, %v983_v49 }
 0x320   : > { %v985_v51 = vmul.f32 1.442695, %v984_v50 }
 0x322   : > { %1300 = vpow2.f32 %v985_v51 }
 0x325   : > { %v817_v52 = vld [vmem:[#allocation3] sm:$0xff] }
 0x326   : > { %819 = vrot.lane.b32.xlu0 %v817_v52, %s1338_s5  ;;  %1227 = vmatpush3.msra.mxu1 %v817_v52 }
 0x327   : > { %v1297_v53 = vpop.eup %1296  ;;  %1236 = vmatprep.subr.mxu1 %v1335_v4 }
 0x328   : > { %v637_v54 = vsel %vm388_vm2, %v1297_v53, 0.0 }
 0x329   : > { %638 = vadd.xlane.f32.xlu1 %v637_v54 }
 0x32a   : > { %994 = vrot.lane.b32.xlu0 %v817_v52, %s1339_s6 }
 0x32b   : > { %v1299_v55 = vpop.eup %1298 }
 0x32c   : > { %v812_v56 = vsel %vm388_vm2, %v1299_v55, 0.0 }
 0x32d   : > { %813 = vadd.xlane.f32.xlu1 %v812_v56 }
 0x32f   : > { %v1301_v57 = vpop.eup %1300 }
 0x330   : > { %v987_v58 = vsel %vm388_vm2, %v1301_v57, 0.0 }
 0x331   : > { %988 = vadd.xlane.f32.xlu1 %v987_v58 }
 0x33f   : > { %v473_v59 = vpop.xlane.xlu1 %472 }
 0x340   : > { %1302 = vrcp.f32 %v473_v59 }
 0x342   : > { %644 = vrot.lane.b32.xlu1 %v817_v52, %s1337_s4 }
 0x34d   : > { %v1303_v60 = vpop.eup %1302 }
 0x34e   : > { %v475_v61 = vmul.f32 %v1303_v60, %v1295_v40 }
 0x350   : > { %1229 = vmatmul.mubr.msk.f32.vlgmr.msra.gmra.mxu1 %vm388_vm2, %v475_v61 }
 0x351   : > { %1238 = vmatprep.mubr.msk.f32.mxu1 %vm1336_vm0, %v1335_v4 }
 0x398   : > { %v820_v3 = vpop.permute.xlu0 %819 }
 0x39c   : > { %v995_v8 = vpop.permute.xlu0 %994 }
 0x3b2   : > { %v639_v62 = vpop.xlane.xlu1 %638 }
 0x3b3   : > { %1304 = vrcp.f32 %v639_v62 }
 0x3b6   : > { %v814_v63 = vpop.xlane.xlu1 %813 }
 0x3b7   : > { %1306 = vrcp.f32 %v814_v63 }
 0x3ba   : > { %v989_v0 = vpop.xlane.xlu1 %988 }
 0x3bb   : > { %1308 = vrcp.f32 %v989_v0 }
 0x3be   : > { %v645_v1 = vpop.permute.xlu1 %644 }
 0x3bf   : > { %1237 = vmatpush3.msra.mxu1 %v645_v1 }
 0x3c0   : > { %v1305_v2 = vpop.eup %1304  ;;  %1246 = vmatprep.subr.mxu1 %v1335_v4 }
 0x3c1   : > { %v641_v5 = vmul.f32 %v1305_v2, %v1297_v53 }
 0x3c3   : > { %1239 = vmatmul.mubr.msk.f32.vlgmr.msra.gmra.mxu1 %vm388_vm2, %v641_v5 }
 0x3c4   : > { %v1307_v6 = vpop.eup %1306  ;;  %1247 = vmatpush3.msra.mxu1 %v820_v3  ;;  %1248 = vmatprep.mubr.msk.f32.mxu1 %vm1336_vm0, %v1335_v4 }
 0x3c5   : > { %1256 = vmatprep.subr.mxu1 %v1335_v4  ;;  %v816_v7 = vmul.f32 %v1307_v6, %v1299_v55 }
 0x3c7   : > { %1249 = vmatmul.mubr.msk.f32.vlgmr.msra.gmra.mxu1 %vm388_vm2, %v816_v7 }
 0x3c8   : > { %v1309_v9 = vpop.eup %1308  ;;  %1257 = vmatpush3.msra.mxu1 %v995_v8  ;;  %1258 = vmatprep.mubr.msk.f32.mxu1 %vm1336_vm0, %v1335_v4 }
 0x3c9   : > { %v991_v10 = vmul.f32 %v1309_v9, %v1301_v57 }
 0x3cb   : > { %1259 = vmatmul.mubr.msk.f32.vlgmr.msra.gmra.mxu1 %vm388_vm2, %v991_v10 }
 0x410   : > { %v546_v11 = vpop.f32.mrf.mxu1 }
 0x411   : > { %550 = vst.msk [vmem:[%s185_s9] sm:$0xff] %vm388_vm2, %v546_v11 }
 0x412   : > { %v1230_v12 = vpop.f32.mrf.mxu1 }
 0x483   : > { %v716_v13 = vpop.f32.mrf.mxu1 }
 0x484   : > { %721 = vrot.lane.b32.xlu0 %v716_v13, %s1340_s10 }
 0x485   : > { %v1240_v14 = vpop.f32.mrf.mxu1 }
 0x487   : > { %v891_v15 = vpop.f32.mrf.mxu1 }
 0x488   : > { %896 = vrot.lane.b32.xlu0 %v891_v15, %s1341_s11 }
 0x489   : > { %v1250_v4 = vpop.f32.mrf.mxu1 }
 0x48b   : > { %v1066_v16 = vpop.f32.mrf.mxu1 }
 0x48c   : > { %1071 = vrot.lane.b32.xlu1 %v1066_v16, %s1342_s16 }
 0x48d   : > { %v1260_v17 = vpop.f32.mrf.mxu1 }
 0x4f6   : > { %v722_v18 = vpop.permute.xlu0 %721 }
 0x4f7   : > { %725 = vst.msk [vmem:[%s185_s9] sm:$0xff] %vm724_vm3, %v722_v18 }
 0x4fa   : > { %v897_v19 = vpop.permute.xlu0 %896 }
 0x4fb   : > { %900 = vst.msk [vmem:[%s185_s9] sm:$0xff] %vm899_vm4, %v897_v19 }
 0x4fe   : > { %v1072_v20 = vpop.permute.xlu1 %1071 }
 0x4ff   : > { %1075 = vst.msk [vmem:[%s185_s9] sm:$0xff] %vm1074_vm5, %v1072_v20 }
 0x500 PF: > { %s13_s14 = sadd.s32 1, %s1332_s14   ;;  %s1498_s12 = smov %s1328_s13 }
 0x501   : > { %p10_p5 = scmp.ge.s32.totalorder %s13_s14, 4   ;;  %s1499_s13 = smov %s1501_s15 }
 0x503   :  { %12 = sbr.rel (!%p10_p5) target bundleno = 2 (0x2), region = 67 }

</bundles_post_ra>
